<compile_context>
chip_gen: v7x
topology: tpu7x:2x2x1
jax: 0.10.0
libtpu: 0.0.40
codegen_flags: <defaults>
</compile_context>

<pallas_src>
import jax
import jax.numpy as jnp
from jax.experimental import pallas as pl
from jax.experimental.pallas import tpu as pltpu

# ---------------- scaled-down ViT-B/32-style config ----------------
B = 2                      # batch
C = 3                      # image channels
IMG = 16                   # image height = width
PATCH = 8                  # patch size (= conv kernel = conv stride)
GRID = IMG // PATCH
NP = GRID * GRID           # 4 patches
S = NP + 1                 # +1 class token -> 5 tokens
D = 32                     # hidden size
HEADS = 2
HD = D // HEADS            # head dim 16
MLP = 4 * D                # 128
LAYERS = 2
EPS = 1e-5

CPP = C * PATCH * PATCH    # 192 patch features
CPP1 = CPP + 1             # +1 CLS-indicator column
CPP_PAD = 256              # reduction dim padded to a multiple of 128
S_PAD = 8                  # token dim padded to a sublane multiple
SCALE = float(HD) ** -0.5


# ---------------- in-kernel helpers ----------------
def _mm(a, b):
    """bf16 MXU matmul with f32 accumulation."""
    return jnp.dot(a.astype(jnp.bfloat16), b.astype(jnp.bfloat16),
                   preferred_element_type=jnp.float32)


def _mm_nt(a, b):
    """a (M,K) @ b (N,K)^T without materializing a transpose."""
    return jax.lax.dot_general(
        a.astype(jnp.bfloat16), b.astype(jnp.bfloat16),
        (((1,), (1,)), ((), ())),
        preferred_element_type=jnp.float32)


def _ln(v, w, b):
    mu = jnp.mean(v, axis=-1, keepdims=True)
    var = jnp.mean((v - mu) ** 2, axis=-1, keepdims=True)
    return (v - mu) * jax.lax.rsqrt(var + EPS) * w + b


# ---------------- fused Pallas kernel (one grid step = one batch, one layer) ----------------
def _clip_kernel(
        x_ref, waug_ref, pos_ref,
        prew_ref, preb_ref, postw_ref, postb_ref,
        ln1w_ref, ln1b_ref, wqkv_ref, bqkv_ref, wo_ref, bo_ref,
        ln2w_ref, ln2b_ref, fc1w_ref, fc1b_ref, fc2w_ref, fc2b_ref,
        hid_ref, pool_ref, hidden):
    layer = pl.program_id(1)

    # ---- embeddings (patch-embed matmul + class embedding + positions) ----
    # Only on the first layer step of each batch element.  The class token is
    # folded into the patch matmul via an augmented indicator column.
    @pl.when(layer == 0)
    def _():
        h0 = _mm(x_ref[0], waug_ref[...]) + pos_ref[...]            # (S_PAD, D)
        hidden[...] = _ln(h0, prew_ref[...], preb_ref[...])         # pre-layernorm

    # padded key columns (token index >= S) are masked out of the softmax
    kmask = jnp.where(
        jax.lax.broadcasted_iota(jnp.int32, (1, S_PAD), 1) < S,
        0.0, -1e9).astype(jnp.float32)

    # ---- self-attention block ----
    res1 = hidden[...]                                              # (S_PAD, D) f32
    h = _ln(res1, ln1w_ref[0], ln1b_ref[0])
    qkv = _mm(h, wqkv_ref[0]) + bqkv_ref[0]                         # (S_PAD, 3D); scale folded into Q
    ctx_heads = []
    for hh in range(HEADS):                                         # static unroll; tiny score matmuls only
        q_h = qkv[:, hh * HD:(hh + 1) * HD]
        k_h = qkv[:, D + hh * HD:D + (hh + 1) * HD]
        v_h = qkv[:, 2 * D + hh * HD:2 * D + (hh + 1) * HD]
        s = _mm_nt(q_h, k_h) + kmask                                # (S_PAD, S_PAD)
        s = s - jnp.max(s, axis=-1, keepdims=True)
        p = jnp.exp(s)
        p = p * pl.reciprocal(jnp.sum(p, axis=-1, keepdims=True), approx=True)
        ctx_heads.append(_mm(p, v_h))                               # (S_PAD, HD)
    ctx = jnp.concatenate(ctx_heads, axis=-1)                       # (S_PAD, D)
    res2 = res1 + _mm(ctx, wo_ref[0]) + bo_ref[0]                   # one fused output projection

    # ---- MLP block (quick_gelu) ----
    h = _ln(res2, ln2w_ref[0], ln2b_ref[0])
    h = _mm(h, fc1w_ref[0]) + fc1b_ref[0]                           # (S_PAD, MLP)
    h = h * pl.reciprocal(1.0 + jnp.exp(-1.702 * h), approx=True)   # quick_gelu
    h = _mm(h, fc2w_ref[0]) + fc2b_ref[0]                           # (S_PAD, D)
    out = res2 + h
    hidden[...] = out

    # ---- finalize on last layer ----
    @pl.when(layer == LAYERS - 1)
    def _():
        # HF CLIPVisionTransformer: last_hidden_state is NOT post-layernormed.
        hid_ref[0] = out
        # pooler_output: post-layernorm of the CLS token (row 0).
        pool_ref[0] = _ln(out[0:1, :], postw_ref[...], postb_ref[...])


# ---------------- parameters (deterministic, synthetic) ----------------
def init_params(seed=0):
    key = jax.random.PRNGKey(seed)
    counter = [0]

    def nrm(shape, scale=0.02):
        counter[0] += 1
        return (scale * jax.random.normal(jax.random.fold_in(key, counter[0]),
                                          shape)).astype(jnp.float32)

    ones_d = jnp.ones((D,), jnp.float32)
    zeros_d = jnp.zeros((D,), jnp.float32)

    params = {
        "conv_w": nrm((D, C, PATCH, PATCH)),   # nn.Conv2d weight layout [out, in, kh, kw]
        "class_emb": nrm((D,)),
        "pos_emb": nrm((S, D)),
        "pre_ln_w": ones_d, "pre_ln_b": zeros_d,
        "post_ln_w": ones_d, "post_ln_b": zeros_d,
        "layers": [],
    }
    for _ in range(LAYERS):
        params["layers"].append({
            "ln1_w": ones_d.reshape(1, D), "ln1_b": zeros_d.reshape(1, D),
            "q_w": nrm((D, D)), "q_b": jnp.zeros((1, D), jnp.float32),
            "k_w": nrm((D, D)), "k_b": jnp.zeros((1, D), jnp.float32),
            "v_w": nrm((D, D)), "v_b": jnp.zeros((1, D), jnp.float32),
            "o_w": nrm((D, D)), "o_b": jnp.zeros((1, D), jnp.float32),
            "ln2_w": ones_d.reshape(1, D), "ln2_b": zeros_d.reshape(1, D),
            "fc1_w": nrm((D, MLP)), "fc1_b": jnp.zeros((1, MLP), jnp.float32),
            "fc2_w": nrm((MLP, D)), "fc2_b": jnp.zeros((1, D), jnp.float32),
        })
    return params


def _prepare_kernel_params(params):
    """Layout plumbing only: stack layers, fuse QKV, fold the attention scale,
    build the augmented/padded patch-embedding weight, cast weights to bf16.
    All compute stays inside the Pallas kernel."""
    f32 = jnp.float32
    bf16 = jnp.bfloat16

    w_patch = params["conv_w"].reshape(D, CPP).T                          # (CPP, D)
    w_aug = jnp.concatenate([w_patch, params["class_emb"].reshape(1, D)], axis=0)
    w_aug = jnp.pad(w_aug, ((0, CPP_PAD - CPP1), (0, 0)))                 # (CPP_PAD, D)

    pos = jnp.pad(params["pos_emb"], ((0, S_PAD - S), (0, 0)))            # (S_PAD, D)

    def stack(name):
        return jnp.stack([lp[name] for lp in params["layers"]], axis=0)

    q_w = stack("q_w") * SCALE                                            # fold 1/sqrt(HD)
    q_b = stack("q_b") * SCALE
    w_qkv = jnp.concatenate([q_w, stack("k_w"), stack("v_w")], axis=-1)   # (L, D, 3D)
    b_qkv = jnp.concatenate([q_b, stack("k_b"), stack("v_b")], axis=-1)   # (L, 1, 3D)

    return {
        "w_aug": w_aug.astype(bf16),
        "pos": pos.astype(f32),
        "pre_w": params["pre_ln_w"].reshape(1, D).astype(f32),
        "pre_b": params["pre_ln_b"].reshape(1, D).astype(f32),
        "post_w": params["post_ln_w"].reshape(1, D).astype(f32),
        "post_b": params["post_ln_b"].reshape(1, D).astype(f32),
        "ln1_w": stack("ln1_w").astype(f32), "ln1_b": stack("ln1_b").astype(f32),
        "w_qkv": w_qkv.astype(bf16), "b_qkv": b_qkv.astype(f32),
        "w_o": stack("o_w").astype(bf16), "b_o": stack("o_b").astype(f32),
        "ln2_w": stack("ln2_w").astype(f32), "ln2_b": stack("ln2_b").astype(f32),
        "fc1_w": stack("fc1_w").astype(bf16), "fc1_b": stack("fc1_b").astype(f32),
        "fc2_w": stack("fc2_w").astype(bf16), "fc2_b": stack("fc2_b").astype(f32),
    }


def _const_spec(shape):
    zeros = (0,) * len(shape)
    return pl.BlockSpec(tuple(shape), lambda b, l: zeros)


def _layer_spec(shape):
    tail = (0,) * (len(shape) - 1)
    return pl.BlockSpec((1,) + tuple(shape[1:]), lambda b, l: (l,) + tail)


# ---------------- forward pass ----------------
def clip_vision_encoder_forward(pixel_values, params):
    """pixel_values: (B, C, IMG, IMG) float32 (NCHW, PyTorch conv layout).
    Returns (last_hidden_state (B, S, D), pooler_output (B, D))."""
    kp = _prepare_kernel_params(params)

    # --- patch extraction: conv(k=P, s=P, bias=False) as patch-matmul input ---
    x = pixel_values.reshape(B, C, GRID, PATCH, GRID, PATCH)
    x = x.transpose(0, 2, 4, 1, 3, 5).reshape(B, NP, CPP)                 # (B, gh*gw, C*P*P)
    # augmented + padded token-feature tensor: row 0 is the CLS indicator
    # (selects the class-embedding row of w_aug); rows 1..S-1 are patches;
    # rows S..S_PAD-1 and columns CPP1..CPP_PAD-1 are zero padding.
    feat = jnp.zeros((B, S_PAD, CPP_PAD), jnp.float32)
    feat = feat.at[:, 0, CPP].set(1.0)
    feat = feat.at[:, 1:S, :CPP].set(x)
    x_aug = feat.astype(jnp.bfloat16)

    in_specs = [
        pl.BlockSpec((1, S_PAD, CPP_PAD), lambda b, l: (b, 0, 0)),        # x_aug
        _const_spec((CPP_PAD, D)),                                        # w_aug
        _const_spec((S_PAD, D)),                                          # pos
        _const_spec((1, D)), _const_spec((1, D)),                         # pre-LN
        _const_spec((1, D)), _const_spec((1, D)),                         # post-LN
        _layer_spec((LAYERS, 1, D)), _layer_spec((LAYERS, 1, D)),         # ln1
        _layer_spec((LAYERS, D, 3 * D)), _layer_spec((LAYERS, 1, 3 * D)),  # qkv
        _layer_spec((LAYERS, D, D)), _layer_spec((LAYERS, 1, D)),         # o
        _layer_spec((LAYERS, 1, D)), _layer_spec((LAYERS, 1, D)),         # ln2
        _layer_spec((LAYERS, D, MLP)), _layer_spec((LAYERS, 1, MLP)),     # fc1
        _layer_spec((LAYERS, MLP, D)), _layer_spec((LAYERS, 1, D)),       # fc2
    ]
    out_specs = (
        pl.BlockSpec((1, S_PAD, D), lambda b, l: (b, 0, 0)),
        pl.BlockSpec((1, 1, D), lambda b, l: (b, 0, 0)),
    )

    hid, pooled = pl.pallas_call(
        _clip_kernel,
        out_shape=(jax.ShapeDtypeStruct((B, S_PAD, D), jnp.float32),
                   jax.ShapeDtypeStruct((B, 1, D), jnp.float32)),
        grid=(B, LAYERS),
        in_specs=in_specs,
        out_specs=out_specs,
        scratch_shapes=[pltpu.VMEM((S_PAD, D), jnp.float32)],             # carried hidden state
        compiler_params=pltpu.CompilerParams(
            dimension_semantics=("parallel", "arbitrary"),
            vmem_limit_bytes=48 * 1024 * 1024),
    )(x_aug, kp["w_aug"], kp["pos"], kp["pre_w"], kp["pre_b"],
      kp["post_w"], kp["post_b"],
      kp["ln1_w"], kp["ln1_b"], kp["w_qkv"], kp["b_qkv"],
      kp["w_o"], kp["b_o"], kp["ln2_w"], kp["ln2_b"],
      kp["fc1_w"], kp["fc1_b"], kp["fc2_w"], kp["fc2_b"])

    last_hidden_state = hid[:, :S, :]          # drop padded token rows
    pooler_output = pooled.reshape(B, D)
    return last_hidden_state, pooler_output


if __name__ == "__main__":
    key = jax.random.PRNGKey(0)
    pixel_values = jax.random.normal(key, (B, C, IMG, IMG), dtype=jnp.float32)
    params = init_params(seed=0)

    fwd = jax.jit(clip_vision_encoder_forward)
    last_hidden_state, pooler_output = fwd(pixel_values, params)
    jax.block_until_ready((last_hidden_state, pooler_output))

    assert last_hidden_state.shape == (B, S, D)
    assert pooler_output.shape == (B, D)
    assert bool(jnp.all(jnp.isfinite(last_hidden_state)))
    assert bool(jnp.all(jnp.isfinite(pooler_output)))
    print("KERNEL_OK")
</pallas_src>

<mosaic_0001>
module attributes {stable_mosaic.version = 11 : i64} {
  func.func @_clip_kernel(%arg0: i32, %arg1: i32, %arg2: memref<1x8x256xbf16, #tpu.memory_space<vmem>>, %arg3: memref<256x32xbf16, #tpu.memory_space<vmem>>, %arg4: memref<8x32xf32, #tpu.memory_space<vmem>>, %arg5: memref<1x32xf32, #tpu.memory_space<vmem>>, %arg6: memref<1x32xf32, #tpu.memory_space<vmem>>, %arg7: memref<1x32xf32, #tpu.memory_space<vmem>>, %arg8: memref<1x32xf32, #tpu.memory_space<vmem>>, %arg9: memref<1x1x32xf32, #tpu.memory_space<vmem>>, %arg10: memref<1x1x32xf32, #tpu.memory_space<vmem>>, %arg11: memref<1x32x96xbf16, #tpu.memory_space<vmem>>, %arg12: memref<1x1x96xf32, #tpu.memory_space<vmem>>, %arg13: memref<1x32x32xbf16, #tpu.memory_space<vmem>>, %arg14: memref<1x1x32xf32, #tpu.memory_space<vmem>>, %arg15: memref<1x1x32xf32, #tpu.memory_space<vmem>>, %arg16: memref<1x1x32xf32, #tpu.memory_space<vmem>>, %arg17: memref<1x32x128xbf16, #tpu.memory_space<vmem>>, %arg18: memref<1x1x128xf32, #tpu.memory_space<vmem>>, %arg19: memref<1x128x32xbf16, #tpu.memory_space<vmem>>, %arg20: memref<1x1x32xf32, #tpu.memory_space<vmem>>, %arg21: memref<1x8x32xf32, #tpu.memory_space<vmem>>, %arg22: memref<1x1x32xf32, #tpu.memory_space<vmem>>, %arg23: memref<8x32xf32, #tpu.memory_space<vmem>>) attributes {dimension_semantics = [#tpu.dimension_semantics<parallel>, #tpu.dimension_semantics<arbitrary>], iteration_bounds = array<i64: 2, 2>, scalar_prefetch = 0 : i64, scratch_operands = 1 : i64, tpu.core_type = #tpu.core_type<tc>, window_params = [{transform_indices = @transform_0, window_bounds = array<i64: 1, 8, 256>}, {pipeline_mode = #tpu.pipeline_mode<synchronous>, transform_indices = @transform_1, window_bounds = array<i64: 256, 32>}, {pipeline_mode = #tpu.pipeline_mode<synchronous>, transform_indices = @transform_2, window_bounds = array<i64: 8, 32>}, {pipeline_mode = #tpu.pipeline_mode<synchronous>, transform_indices = @transform_3, window_bounds = array<i64: 1, 32>}, {pipeline_mode = #tpu.pipeline_mode<synchronous>, transform_indices = @transform_4, window_bounds = array<i64: 1, 32>}, {pipeline_mode = #tpu.pipeline_mode<synchronous>, transform_indices = @transform_5, window_bounds = array<i64: 1, 32>}, {pipeline_mode = #tpu.pipeline_mode<synchronous>, transform_indices = @transform_6, window_bounds = array<i64: 1, 32>}, {transform_indices = @transform_7, window_bounds = array<i64: 1, 1, 32>}, {transform_indices = @transform_8, window_bounds = array<i64: 1, 1, 32>}, {transform_indices = @transform_9, window_bounds = array<i64: 1, 32, 96>}, {transform_indices = @transform_10, window_bounds = array<i64: 1, 1, 96>}, {transform_indices = @transform_11, window_bounds = array<i64: 1, 32, 32>}, {transform_indices = @transform_12, window_bounds = array<i64: 1, 1, 32>}, {transform_indices = @transform_13, window_bounds = array<i64: 1, 1, 32>}, {transform_indices = @transform_14, window_bounds = array<i64: 1, 1, 32>}, {transform_indices = @transform_15, window_bounds = array<i64: 1, 32, 128>}, {transform_indices = @transform_16, window_bounds = array<i64: 1, 1, 128>}, {transform_indices = @transform_17, window_bounds = array<i64: 1, 128, 32>}, {transform_indices = @transform_18, window_bounds = array<i64: 1, 1, 32>}, {transform_indices = @transform_19, window_bounds = array<i64: 1, 8, 32>}, {transform_indices = @transform_20, window_bounds = array<i64: 1, 1, 32>}]} {
    %c0_i32 = arith.constant 0 : i32
    %0 = arith.cmpi eq, %arg1, %c0_i32 : i32
    %1 = arith.extui %0 : i1 to i32
    %c0_i32_0 = arith.constant 0 : i32
    %2 = arith.cmpi ne, %1, %c0_i32_0 : i32
    scf.if %2 {
      %c0_66 = arith.constant 0 : index
      %c0_67 = arith.constant 0 : index
      %c0_68 = arith.constant 0 : index
      %150 = vector.load %arg2[%c0_66, %c0_67, %c0_68] : memref<1x8x256xbf16, #tpu.memory_space<vmem>>, vector<1x8x256xbf16>
      %151 = vector.shape_cast %150 : vector<1x8x256xbf16> to vector<8x256xbf16>
      %c0_69 = arith.constant 0 : index
      %c0_70 = arith.constant 0 : index
      %152 = vector.load %arg3[%c0_69, %c0_70] : memref<256x32xbf16, #tpu.memory_space<vmem>>, vector<256x32xbf16>
      %cst_71 = arith.constant dense<0.000000e+00> : vector<8x32xf32>
      %153 = tpu.matmul %151, %152, %cst_71 {dimension_numbers = #tpu.dot_dimension_numbers<[1], [0], [0], [1], [0, 0, 1, 1], [], []>} : vector<8x256xbf16>, vector<256x32xbf16>, vector<8x32xf32> -> vector<8x32xf32>
      %c0_72 = arith.constant 0 : index
      %c0_73 = arith.constant 0 : index
      %154 = vector.load %arg4[%c0_72, %c0_73] : memref<8x32xf32, #tpu.memory_space<vmem>>, vector<8x32xf32>
      %155 = arith.addf %153, %154 : vector<8x32xf32>
      %c0_74 = arith.constant 0 : index
      %c0_75 = arith.constant 0 : index
      %156 = vector.load %arg5[%c0_74, %c0_75] : memref<1x32xf32, #tpu.memory_space<vmem>>, vector<1x32xf32>
      %c0_76 = arith.constant 0 : index
      %c0_77 = arith.constant 0 : index
      %157 = vector.load %arg6[%c0_76, %c0_77] : memref<1x32xf32, #tpu.memory_space<vmem>>, vector<1x32xf32>
      %cst_78 = arith.constant dense<0.000000e+00> : vector<8xf32>
      %158 = vector.multi_reduction <add>, %155, %cst_78 [1] : vector<8x32xf32> to vector<8xf32>
      %159 = vector.shape_cast %158 : vector<8xf32> to vector<8x1xf32>
      %cst_79 = arith.constant 3.200000e+01 : f32
      %160 = vector.broadcast %cst_79 : f32 to vector<8x1xf32>
      %161 = arith.divf %159, %160 : vector<8x1xf32>
      %162 = vector.broadcast %161 : vector<8x1xf32> to vector<8x32xf32>
      %163 = arith.subf %155, %162 : vector<8x32xf32>
      %164 = arith.mulf %163, %163 : vector<8x32xf32>
      %cst_80 = arith.constant dense<0.000000e+00> : vector<8xf32>
      %165 = vector.multi_reduction <add>, %164, %cst_80 [1] : vector<8x32xf32> to vector<8xf32>
      %166 = vector.shape_cast %165 : vector<8xf32> to vector<8x1xf32>
      %cst_81 = arith.constant 3.200000e+01 : f32
      %167 = vector.broadcast %cst_81 : f32 to vector<8x1xf32>
      %168 = arith.divf %166, %167 : vector<8x1xf32>
      %169 = vector.broadcast %161 : vector<8x1xf32> to vector<8x32xf32>
      %170 = arith.subf %155, %169 : vector<8x32xf32>
      %cst_82 = arith.constant 9.99999974E-6 : f32
      %171 = vector.broadcast %cst_82 : f32 to vector<8x1xf32>
      %172 = arith.addf %168, %171 : vector<8x1xf32>
      %173 = math.rsqrt %172 : vector<8x1xf32>
      %174 = vector.broadcast %173 : vector<8x1xf32> to vector<8x32xf32>
      %175 = arith.mulf %170, %174 : vector<8x32xf32>
      %176 = vector.broadcast %156 : vector<1x32xf32> to vector<8x32xf32>
      %177 = arith.mulf %175, %176 : vector<8x32xf32>
      %178 = vector.broadcast %157 : vector<1x32xf32> to vector<8x32xf32>
      %179 = arith.addf %177, %178 : vector<8x32xf32>
      %c0_83 = arith.constant 0 : index
      %c0_84 = arith.constant 0 : index
      %180 = vector.load %arg23[%c0_83, %c0_84] : memref<8x32xf32, #tpu.memory_space<vmem>>, vector<8x32xf32>
      tpu.vector_store %arg23[%c0_83, %c0_84], %179 {strides = array<i32>} : memref<8x32xf32, #tpu.memory_space<vmem>>, vector<8x32xf32>,
    } else {
    }
    %3 = tpu.iota {dimensions = array<i32: 1>} : vector<1x8xi32>
    %c5_i32 = arith.constant 5 : i32
    %4 = vector.broadcast %c5_i32 : i32 to vector<1x8xi32>
    %5 = arith.cmpi slt, %3, %4 : vector<1x8xi32>
    %cst = arith.constant 0.000000e+00 : f32
    %cst_1 = arith.constant -1.000000e+09 : f32
    %6 = vector.broadcast %cst : f32 to vector<1x8xf32>
    %7 = vector.broadcast %cst_1 : f32 to vector<1x8xf32>
    %8 = arith.select %5, %6, %7 : vector<1x8xi1>, vector<1x8xf32>
    %c0 = arith.constant 0 : index
    %c0_2 = arith.constant 0 : index
    %9 = vector.load %arg23[%c0, %c0_2] : memref<8x32xf32, #tpu.memory_space<vmem>>, vector<8x32xf32>
    %c0_3 = arith.constant 0 : index
    %c0_4 = arith.constant 0 : index
    %c0_5 = arith.constant 0 : index
    %10 = vector.load %arg9[%c0_3, %c0_4, %c0_5] : memref<1x1x32xf32, #tpu.memory_space<vmem>>, vector<1x1x32xf32>
    %11 = vector.shape_cast %10 : vector<1x1x32xf32> to vector<1x32xf32>
    %c0_6 = arith.constant 0 : index
    %c0_7 = arith.constant 0 : index
    %c0_8 = arith.constant 0 : index
    %12 = vector.load %arg10[%c0_6, %c0_7, %c0_8] : memref<1x1x32xf32, #tpu.memory_space<vmem>>, vector<1x1x32xf32>
    %13 = vector.shape_cast %12 : vector<1x1x32xf32> to vector<1x32xf32>
    %cst_9 = arith.constant dense<0.000000e+00> : vector<8xf32>
    %14 = vector.multi_reduction <add>, %9, %cst_9 [1] : vector<8x32xf32> to vector<8xf32>
    %15 = vector.shape_cast %14 : vector<8xf32> to vector<8x1xf32>
    %cst_10 = arith.constant 3.200000e+01 : f32
    %16 = vector.broadcast %cst_10 : f32 to vector<8x1xf32>
    %17 = arith.divf %15, %16 : vector<8x1xf32>
    %18 = vector.broadcast %17 : vector<8x1xf32> to vector<8x32xf32>
    %19 = arith.subf %9, %18 : vector<8x32xf32>
    %20 = arith.mulf %19, %19 : vector<8x32xf32>
    %cst_11 = arith.constant dense<0.000000e+00> : vector<8xf32>
    %21 = vector.multi_reduction <add>, %20, %cst_11 [1] : vector<8x32xf32> to vector<8xf32>
    %22 = vector.shape_cast %21 : vector<8xf32> to vector<8x1xf32>
    %cst_12 = arith.constant 3.200000e+01 : f32
    %23 = vector.broadcast %cst_12 : f32 to vector<8x1xf32>
    %24 = arith.divf %22, %23 : vector<8x1xf32>
    %25 = vector.broadcast %17 : vector<8x1xf32> to vector<8x32xf32>
    %26 = arith.subf %9, %25 : vector<8x32xf32>
    %cst_13 = arith.constant 9.99999974E-6 : f32
    %27 = vector.broadcast %cst_13 : f32 to vector<8x1xf32>
    %28 = arith.addf %24, %27 : vector<8x1xf32>
    %29 = math.rsqrt %28 : vector<8x1xf32>
    %30 = vector.broadcast %29 : vector<8x1xf32> to vector<8x32xf32>
    %31 = arith.mulf %26, %30 : vector<8x32xf32>
    %32 = vector.broadcast %11 : vector<1x32xf32> to vector<8x32xf32>
    %33 = arith.mulf %31, %32 : vector<8x32xf32>
    %34 = vector.broadcast %13 : vector<1x32xf32> to vector<8x32xf32>
    %35 = arith.addf %33, %34 : vector<8x32xf32>
    %c0_14 = arith.constant 0 : index
    %c0_15 = arith.constant 0 : index
    %c0_16 = arith.constant 0 : index
    %36 = vector.load %arg11[%c0_14, %c0_15, %c0_16] : memref<1x32x96xbf16, #tpu.memory_space<vmem>>, vector<1x32x96xbf16>
    %37 = vector.shape_cast %36 : vector<1x32x96xbf16> to vector<32x96xbf16>
    %38 = arith.truncf %35 : vector<8x32xf32> to vector<8x32xbf16>
    %cst_17 = arith.constant dense<0.000000e+00> : vector<8x96xf32>
    %39 = tpu.matmul %38, %37, %cst_17 {dimension_numbers = #tpu.dot_dimension_numbers<[1], [0], [0], [1], [0, 0, 1, 1], [], []>} : vector<8x32xbf16>, vector<32x96xbf16>, vector<8x96xf32> -> vector<8x96xf32>
    %c0_18 = arith.constant 0 : index
    %c0_19 = arith.constant 0 : index
    %c0_20 = arith.constant 0 : index
    %40 = vector.load %arg12[%c0_18, %c0_19, %c0_20] : memref<1x1x96xf32, #tpu.memory_space<vmem>>, vector<1x1x96xf32>
    %41 = vector.shape_cast %40 : vector<1x1x96xf32> to vector<1x96xf32>
    %42 = vector.broadcast %41 : vector<1x96xf32> to vector<8x96xf32>
    %43 = arith.addf %39, %42 : vector<8x96xf32>
    %44 = vector.extract_strided_slice %43 {offsets = [0, 0], sizes = [8, 16], strides = [1, 1]} : vector<8x96xf32> to vector<8x16xf32>
    %45 = vector.extract_strided_slice %43 {offsets = [0, 32], sizes = [8, 16], strides = [1, 1]} : vector<8x96xf32> to vector<8x16xf32>
    %46 = vector.extract_strided_slice %43 {offsets = [0, 64], sizes = [8, 16], strides = [1, 1]} : vector<8x96xf32> to vector<8x16xf32>
    %47 = arith.truncf %44 : vector<8x16xf32> to vector<8x16xbf16>
    %48 = arith.truncf %45 : vector<8x16xf32> to vector<8x16xbf16>
    %cst_21 = arith.constant dense<0.000000e+00> : vector<8x8xf32>
    %49 = tpu.matmul %47, %48, %cst_21 {dimension_numbers = #tpu.dot_dimension_numbers<[1], [1], [0], [0], [0, 0, 1, 0], [], []>} : vector<8x16xbf16>, vector<8x16xbf16>, vector<8x8xf32> -> vector<8x8xf32>
    %50 = vector.broadcast %8 : vector<1x8xf32> to vector<8x8xf32>
    %51 = arith.addf %49, %50 : vector<8x8xf32>
    %cst_22 = arith.constant dense<0xFF800000> : vector<8xf32>
    %52 = vector.multi_reduction <maximumf>, %51, %cst_22 [1] : vector<8x8xf32> to vector<8xf32>
    %53 = vector.shape_cast %52 : vector<8xf32> to vector<8x1xf32>
    %54 = vector.broadcast %53 : vector<8x1xf32> to vector<8x8xf32>
    %55 = arith.subf %51, %54 : vector<8x8xf32>
    %56 = math.exp %55 : vector<8x8xf32>
    %cst_23 = arith.constant dense<0.000000e+00> : vector<8xf32>
    %57 = vector.multi_reduction <add>, %56, %cst_23 [1] : vector<8x8xf32> to vector<8xf32>
    %58 = vector.shape_cast %57 : vector<8xf32> to vector<8x1xf32>
    %59 = tpu.reciprocal %58 {approx = true} : vector<8x1xf32> -> vector<8x1xf32>
    %60 = vector.broadcast %59 : vector<8x1xf32> to vector<8x8xf32>
    %61 = arith.mulf %56, %60 : vector<8x8xf32>
    %62 = arith.truncf %61 : vector<8x8xf32> to vector<8x8xbf16>
    %63 = arith.truncf %46 : vector<8x16xf32> to vector<8x16xbf16>
    %cst_24 = arith.constant dense<0.000000e+00> : vector<8x16xf32>
    %64 = tpu.matmul %62, %63, %cst_24 {dimension_numbers = #tpu.dot_dimension_numbers<[1], [0], [0], [1], [0, 0, 1, 1], [], []>} : vector<8x8xbf16>, vector<8x16xbf16>, vector<8x16xf32> -> vector<8x16xf32>
    %65 = vector.extract_strided_slice %43 {offsets = [0, 16], sizes = [8, 16], strides = [1, 1]} : vector<8x96xf32> to vector<8x16xf32>
    %66 = vector.extract_strided_slice %43 {offsets = [0, 48], sizes = [8, 16], strides = [1, 1]} : vector<8x96xf32> to vector<8x16xf32>
    %67 = vector.extract_strided_slice %43 {offsets = [0, 80], sizes = [8, 16], strides = [1, 1]} : vector<8x96xf32> to vector<8x16xf32>
    %68 = arith.truncf %65 : vector<8x16xf32> to vector<8x16xbf16>
    %69 = arith.truncf %66 : vector<8x16xf32> to vector<8x16xbf16>
    %cst_25 = arith.constant dense<0.000000e+00> : vector<8x8xf32>
    %70 = tpu.matmul %68, %69, %cst_25 {dimension_numbers = #tpu.dot_dimension_numbers<[1], [1], [0], [0], [0, 0, 1, 0], [], []>} : vector<8x16xbf16>, vector<8x16xbf16>, vector<8x8xf32> -> vector<8x8xf32>
    %71 = vector.broadcast %8 : vector<1x8xf32> to vector<8x8xf32>
    %72 = arith.addf %70, %71 : vector<8x8xf32>
    %cst_26 = arith.constant dense<0xFF800000> : vector<8xf32>
    %73 = vector.multi_reduction <maximumf>, %72, %cst_26 [1] : vector<8x8xf32> to vector<8xf32>
    %74 = vector.shape_cast %73 : vector<8xf32> to vector<8x1xf32>
    %75 = vector.broadcast %74 : vector<8x1xf32> to vector<8x8xf32>
    %76 = arith.subf %72, %75 : vector<8x8xf32>
    %77 = math.exp %76 : vector<8x8xf32>
    %cst_27 = arith.constant dense<0.000000e+00> : vector<8xf32>
    %78 = vector.multi_reduction <add>, %77, %cst_27 [1] : vector<8x8xf32> to vector<8xf32>
    %79 = vector.shape_cast %78 : vector<8xf32> to vector<8x1xf32>
    %80 = tpu.reciprocal %79 {approx = true} : vector<8x1xf32> -> vector<8x1xf32>
    %81 = vector.broadcast %80 : vector<8x1xf32> to vector<8x8xf32>
    %82 = arith.mulf %77, %81 : vector<8x8xf32>
    %83 = arith.truncf %82 : vector<8x8xf32> to vector<8x8xbf16>
    %84 = arith.truncf %67 : vector<8x16xf32> to vector<8x16xbf16>
    %cst_28 = arith.constant dense<0.000000e+00> : vector<8x16xf32>
    %85 = tpu.matmul %83, %84, %cst_28 {dimension_numbers = #tpu.dot_dimension_numbers<[1], [0], [0], [1], [0, 0, 1, 1], [], []>} : vector<8x8xbf16>, vector<8x16xbf16>, vector<8x16xf32> -> vector<8x16xf32>
    %86 = tpu.concatenate %64, %85 in 1 : vector<8x16xf32>, vector<8x16xf32> -> vector<8x32xf32>
    %c0_29 = arith.constant 0 : index
    %c0_30 = arith.constant 0 : index
    %c0_31 = arith.constant 0 : index
    %87 = vector.load %arg13[%c0_29, %c0_30, %c0_31] : memref<1x32x32xbf16, #tpu.memory_space<vmem>>, vector<1x32x32xbf16>
    %88 = vector.shape_cast %87 : vector<1x32x32xbf16> to vector<32x32xbf16>
    %89 = arith.truncf %86 : vector<8x32xf32> to vector<8x32xbf16>
    %cst_32 = arith.constant dense<0.000000e+00> : vector<8x32xf32>
    %90 = tpu.matmul %89, %88, %cst_32 {dimension_numbers = #tpu.dot_dimension_numbers<[1], [0], [0], [1], [0, 0, 1, 1], [], []>} : vector<8x32xbf16>, vector<32x32xbf16>, vector<8x32xf32> -> vector<8x32xf32>
    %91 = arith.addf %9, %90 : vector<8x32xf32>
    %c0_33 = arith.constant 0 : index
    %c0_34 = arith.constant 0 : index
    %c0_35 = arith.constant 0 : index
    %92 = vector.load %arg14[%c0_33, %c0_34, %c0_35] : memref<1x1x32xf32, #tpu.memory_space<vmem>>, vector<1x1x32xf32>
    %93 = vector.shape_cast %92 : vector<1x1x32xf32> to vector<1x32xf32>
    %94 = vector.broadcast %93 : vector<1x32xf32> to vector<8x32xf32>
    %95 = arith.addf %91, %94 : vector<8x32xf32>
    %c0_36 = arith.constant 0 : index
    %c0_37 = arith.constant 0 : index
    %c0_38 = arith.constant 0 : index
    %96 = vector.load %arg15[%c0_36, %c0_37, %c0_38] : memref<1x1x32xf32, #tpu.memory_space<vmem>>, vector<1x1x32xf32>
    %97 = vector.shape_cast %96 : vector<1x1x32xf32> to vector<1x32xf32>
    %c0_39 = arith.constant 0 : index
    %c0_40 = arith.constant 0 : index
    %c0_41 = arith.constant 0 : index
    %98 = vector.load %arg16[%c0_39, %c0_40, %c0_41] : memref<1x1x32xf32, #tpu.memory_space<vmem>>, vector<1x1x32xf32>
    %99 = vector.shape_cast %98 : vector<1x1x32xf32> to vector<1x32xf32>
    %cst_42 = arith.constant dense<0.000000e+00> : vector<8xf32>
    %100 = vector.multi_reduction <add>, %95, %cst_42 [1] : vector<8x32xf32> to vector<8xf32>
    %101 = vector.shape_cast %100 : vector<8xf32> to vector<8x1xf32>
    %cst_43 = arith.constant 3.200000e+01 : f32
    %102 = vector.broadcast %cst_43 : f32 to vector<8x1xf32>
    %103 = arith.divf %101, %102 : vector<8x1xf32>
    %104 = vector.broadcast %103 : vector<8x1xf32> to vector<8x32xf32>
    %105 = arith.subf %95, %104 : vector<8x32xf32>
    %106 = arith.mulf %105, %105 : vector<8x32xf32>
    %cst_44 = arith.constant dense<0.000000e+00> : vector<8xf32>
    %107 = vector.multi_reduction <add>, %106, %cst_44 [1] : vector<8x32xf32> to vector<8xf32>
    %108 = vector.shape_cast %107 : vector<8xf32> to vector<8x1xf32>
    %cst_45 = arith.constant 3.200000e+01 : f32
    %109 = vector.broadcast %cst_45 : f32 to vector<8x1xf32>
    %110 = arith.divf %108, %109 : vector<8x1xf32>
    %111 = vector.broadcast %103 : vector<8x1xf32> to vector<8x32xf32>
    %112 = arith.subf %95, %111 : vector<8x32xf32>
    %cst_46 = arith.constant 9.99999974E-6 : f32
    %113 = vector.broadcast %cst_46 : f32 to vector<8x1xf32>
    %114 = arith.addf %110, %113 : vector<8x1xf32>
    %115 = math.rsqrt %114 : vector<8x1xf32>
    %116 = vector.broadcast %115 : vector<8x1xf32> to vector<8x32xf32>
    %117 = arith.mulf %112, %116 : vector<8x32xf32>
    %118 = vector.broadcast %97 : vector<1x32xf32> to vector<8x32xf32>
    %119 = arith.mulf %117, %118 : vector<8x32xf32>
    %120 = vector.broadcast %99 : vector<1x32xf32> to vector<8x32xf32>
    %121 = arith.addf %119, %120 : vector<8x32xf32>
    %c0_47 = arith.constant 0 : index
    %c0_48 = arith.constant 0 : index
    %c0_49 = arith.constant 0 : index
    %122 = vector.load %arg17[%c0_47, %c0_48, %c0_49] : memref<1x32x128xbf16, #tpu.memory_space<vmem>>, vector<1x32x128xbf16>
    %123 = vector.shape_cast %122 : vector<1x32x128xbf16> to vector<32x128xbf16>
    %124 = arith.truncf %121 : vector<8x32xf32> to vector<8x32xbf16>
    %cst_50 = arith.constant dense<0.000000e+00> : vector<8x128xf32>
    %125 = tpu.matmul %124, %123, %cst_50 {dimension_numbers = #tpu.dot_dimension_numbers<[1], [0], [0], [1], [0, 0, 1, 1], [], []>} : vector<8x32xbf16>, vector<32x128xbf16>, vector<8x128xf32> -> vector<8x128xf32>
    %c0_51 = arith.constant 0 : index
    %c0_52 = arith.constant 0 : index
    %c0_53 = arith.constant 0 : index
    %126 = vector.load %arg18[%c0_51, %c0_52, %c0_53] : memref<1x1x128xf32, #tpu.memory_space<vmem>>, vector<1x1x128xf32>
    %127 = vector.shape_cast %126 : vector<1x1x128xf32> to vector<1x128xf32>
    %128 = vector.broadcast %127 : vector<1x128xf32> to vector<8x128xf32>
    %129 = arith.addf %125, %128 : vector<8x128xf32>
    %cst_54 = arith.constant -1.702000e+00 : f32
    %130 = vector.broadcast %cst_54 : f32 to vector<8x128xf32>
    %131 = arith.mulf %130, %129 : vector<8x128xf32>
    %132 = math.exp %131 : vector<8x128xf32>
    %cst_55 = arith.constant 1.000000e+00 : f32
    %133 = vector.broadcast %cst_55 : f32 to vector<8x128xf32>
    %134 = arith.addf %133, %132 : vector<8x128xf32>
    %135 = tpu.reciprocal %134 {approx = true} : vector<8x128xf32> -> vector<8x128xf32>
    %136 = arith.mulf %129, %135 : vector<8x128xf32>
    %c0_56 = arith.constant 0 : index
    %c0_57 = arith.constant 0 : index
    %c0_58 = arith.constant 0 : index
    %137 = vector.load %arg19[%c0_56, %c0_57, %c0_58] : memref<1x128x32xbf16, #tpu.memory_space<vmem>>, vector<1x128x32xbf16>
    %138 = vector.shape_cast %137 : vector<1x128x32xbf16> to vector<128x32xbf16>
    %139 = arith.truncf %136 : vector<8x128xf32> to vector<8x128xbf16>
    %cst_59 = arith.constant dense<0.000000e+00> : vector<8x32xf32>
    %140 = tpu.matmul %139, %138, %cst_59 {dimension_numbers = #tpu.dot_dimension_numbers<[1], [0], [0], [1], [0, 0, 1, 1], [], []>} : vector<8x128xbf16>, vector<128x32xbf16>, vector<8x32xf32> -> vector<8x32xf32>
    %c0_60 = arith.constant 0 : index
    %c0_61 = arith.constant 0 : index
    %c0_62 = arith.constant 0 : index
    %141 = vector.load %arg20[%c0_60, %c0_61, %c0_62] : memref<1x1x32xf32, #tpu.memory_space<vmem>>, vector<1x1x32xf32>
    %142 = vector.shape_cast %141 : vector<1x1x32xf32> to vector<1x32xf32>
    %143 = vector.broadcast %142 : vector<1x32xf32> to vector<8x32xf32>
    %144 = arith.addf %140, %143 : vector<8x32xf32>
    %145 = arith.addf %95, %144 : vector<8x32xf32>
    %c0_63 = arith.constant 0 : index
    %c0_64 = arith.constant 0 : index
    %146 = vector.load %arg23[%c0_63, %c0_64] : memref<8x32xf32, #tpu.memory_space<vmem>>, vector<8x32xf32>
    tpu.vector_store %arg23[%c0_63, %c0_64], %145 {strides = array<i32>} : memref<8x32xf32, #tpu.memory_space<vmem>>, vector<8x32xf32>,
    %c1_i32 = arith.constant 1 : i32
    %147 = arith.cmpi eq, %arg1, %c1_i32 : i32
    %148 = arith.extui %147 : i1 to i32
    %c0_i32_65 = arith.constant 0 : i32
    %149 = arith.cmpi ne, %148, %c0_i32_65 : i32
    scf.if %149 {
      %c0_66 = arith.constant 0 : index
      %c0_67 = arith.constant 0 : index
      %c0_68 = arith.constant 0 : index
      %150 = vector.load %arg21[%c0_66, %c0_67, %c0_68] : memref<1x8x32xf32, #tpu.memory_space<vmem>>, vector<1x8x32xf32>
      %151 = vector.shape_cast %150 : vector<1x8x32xf32> to vector<8x32xf32>
      %152 = vector.shape_cast %145 : vector<8x32xf32> to vector<1x8x32xf32>
      tpu.vector_store %arg21[%c0_66, %c0_67, %c0_68], %152 {strides = array<i32>} : memref<1x8x32xf32, #tpu.memory_space<vmem>>, vector<1x8x32xf32>,
      %153 = vector.extract_strided_slice %145 {offsets = [0, 0], sizes = [1, 32], strides = [1, 1]} : vector<8x32xf32> to vector<1x32xf32>
      %c0_69 = arith.constant 0 : index
      %c0_70 = arith.constant 0 : index
      %154 = vector.load %arg7[%c0_69, %c0_70] : memref<1x32xf32, #tpu.memory_space<vmem>>, vector<1x32xf32>
      %c0_71 = arith.constant 0 : index
      %c0_72 = arith.constant 0 : index
      %155 = vector.load %arg8[%c0_71, %c0_72] : memref<1x32xf32, #tpu.memory_space<vmem>>, vector<1x32xf32>
      %cst_73 = arith.constant dense<0.000000e+00> : vector<1xf32>
      %156 = vector.multi_reduction <add>, %153, %cst_73 [1] : vector<1x32xf32> to vector<1xf32>
      %157 = vector.shape_cast %156 : vector<1xf32> to vector<1x1xf32>
      %cst_74 = arith.constant 3.200000e+01 : f32
      %158 = vector.broadcast %cst_74 : f32 to vector<1x1xf32>
      %159 = arith.divf %157, %158 : vector<1x1xf32>
      %160 = vector.broadcast %159 : vector<1x1xf32> to vector<1x32xf32>
      %161 = arith.subf %153, %160 : vector<1x32xf32>
      %162 = arith.mulf %161, %161 : vector<1x32xf32>
      %cst_75 = arith.constant dense<0.000000e+00> : vector<1xf32>
      %163 = vector.multi_reduction <add>, %162, %cst_75 [1] : vector<1x32xf32> to vector<1xf32>
      %164 = vector.shape_cast %163 : vector<1xf32> to vector<1x1xf32>
      %cst_76 = arith.constant 3.200000e+01 : f32
      %165 = vector.broadcast %cst_76 : f32 to vector<1x1xf32>
      %166 = arith.divf %164, %165 : vector<1x1xf32>
      %167 = vector.broadcast %159 : vector<1x1xf32> to vector<1x32xf32>
      %168 = arith.subf %153, %167 : vector<1x32xf32>
      %cst_77 = arith.constant 9.99999974E-6 : f32
      %169 = vector.broadcast %cst_77 : f32 to vector<1x1xf32>
      %170 = arith.addf %166, %169 : vector<1x1xf32>
      %171 = math.rsqrt %170 : vector<1x1xf32>
      %172 = vector.broadcast %171 : vector<1x1xf32> to vector<1x32xf32>
      %173 = arith.mulf %168, %172 : vector<1x32xf32>
      %174 = arith.mulf %173, %154 : vector<1x32xf32>
      %175 = arith.addf %174, %155 : vector<1x32xf32>
      %c0_78 = arith.constant 0 : index
      %c0_79 = arith.constant 0 : index
      %c0_80 = arith.constant 0 : index
      %176 = vector.load %arg22[%c0_78, %c0_79, %c0_80] : memref<1x1x32xf32, #tpu.memory_space<vmem>>, vector<1x1x32xf32>
      %177 = vector.shape_cast %176 : vector<1x1x32xf32> to vector<1x32xf32>
      %178 = vector.shape_cast %175 : vector<1x32xf32> to vector<1x1x32xf32>
      tpu.vector_store %arg22[%c0_78, %c0_79, %c0_80], %178 {strides = array<i32>} : memref<1x1x32xf32, #tpu.memory_space<vmem>>, vector<1x1x32xf32>,
    } else {
    }
    return
  }
  func.func @transform_0(%arg0: i32, %arg1: i32) -> (i32, i32, i32) {
    %c0_i32 = arith.constant 0 : i32
    %c0_i32_0 = arith.constant 0 : i32
    %c0_i32_1 = arith.constant 0 : i32
    return %arg0, %c0_i32, %c0_i32_0 : i32, i32, i32
  }
  func.func @transform_1(%arg0: i32, %arg1: i32) -> (i32, i32) {
    %c0_i32 = arith.constant 0 : i32
    %c0_i32_0 = arith.constant 0 : i32
    %c0_i32_1 = arith.constant 0 : i32
    return %c0_i32, %c0_i32_0 : i32, i32
  }
  func.func @transform_2(%arg0: i32, %arg1: i32) -> (i32, i32) {
    %c0_i32 = arith.constant 0 : i32
    %c0_i32_0 = arith.constant 0 : i32
    %c0_i32_1 = arith.constant 0 : i32
    return %c0_i32, %c0_i32_0 : i32, i32
  }
  func.func @transform_3(%arg0: i32, %arg1: i32) -> (i32, i32) {
    %c0_i32 = arith.constant 0 : i32
    %c0_i32_0 = arith.constant 0 : i32
    %c0_i32_1 = arith.constant 0 : i32
    return %c0_i32, %c0_i32_0 : i32, i32
  }
  func.func @transform_4(%arg0: i32, %arg1: i32) -> (i32, i32) {
    %c0_i32 = arith.constant 0 : i32
    %c0_i32_0 = arith.constant 0 : i32
    %c0_i32_1 = arith.constant 0 : i32
    return %c0_i32, %c0_i32_0 : i32, i32
  }
  func.func @transform_5(%arg0: i32, %arg1: i32) -> (i32, i32) {
    %c0_i32 = arith.constant 0 : i32
    %c0_i32_0 = arith.constant 0 : i32
    %c0_i32_1 = arith.constant 0 : i32
    return %c0_i32, %c0_i32_0 : i32, i32
  }
  func.func @transform_6(%arg0: i32, %arg1: i32) -> (i32, i32) {
    %c0_i32 = arith.constant 0 : i32
    %c0_i32_0 = arith.constant 0 : i32
    %c0_i32_1 = arith.constant 0 : i32
    return %c0_i32, %c0_i32_0 : i32, i32
  }
  func.func @transform_7(%arg0: i32, %arg1: i32) -> (i32, i32, i32) {
    %c0_i32 = arith.constant 0 : i32
    %c0_i32_0 = arith.constant 0 : i32
    %c0_i32_1 = arith.constant 0 : i32
    return %arg1, %c0_i32, %c0_i32_0 : i32, i32, i32
  }
  func.func @transform_8(%arg0: i32, %arg1: i32) -> (i32, i32, i32) {
    %c0_i32 = arith.constant 0 : i32
    %c0_i32_0 = arith.constant 0 : i32
    %c0_i32_1 = arith.constant 0 : i32
    return %arg1, %c0_i32, %c0_i32_0 : i32, i32, i32
  }
  func.func @transform_9(%arg0: i32, %arg1: i32) -> (i32, i32, i32) {
    %c0_i32 = arith.constant 0 : i32
    %c0_i32_0 = arith.constant 0 : i32
    %c0_i32_1 = arith.constant 0 : i32
    return %arg1, %c0_i32, %c0_i32_0 : i32, i32, i32
  }
  func.func @transform_10(%arg0: i32, %arg1: i32) -> (i32, i32, i32) {
    %c0_i32 = arith.constant 0 : i32
    %c0_i32_0 = arith.constant 0 : i32
    %c0_i32_1 = arith.constant 0 : i32
    return %arg1, %c0_i32, %c0_i32_0 : i32, i32, i32
  }
  func.func @transform_11(%arg0: i32, %arg1: i32) -> (i32, i32, i32) {
    %c0_i32 = arith.constant 0 : i32
    %c0_i32_0 = arith.constant 0 : i32
    %c0_i32_1 = arith.constant 0 : i32
    return %arg1, %c0_i32, %c0_i32_0 : i32, i32, i32
  }
  func.func @transform_12(%arg0: i32, %arg1: i32) -> (i32, i32, i32) {
    %c0_i32 = arith.constant 0 : i32
    %c0_i32_0 = arith.constant 0 : i32
    %c0_i32_1 = arith.constant 0 : i32
    return %arg1, %c0_i32, %c0_i32_0 : i32, i32, i32
  }
  func.func @transform_13(%arg0: i32, %arg1: i32) -> (i32, i32, i32) {
    %c0_i32 = arith.constant 0 : i32
    %c0_i32_0 = arith.constant 0 : i32
    %c0_i32_1 = arith.constant 0 : i32
    return %arg1, %c0_i32, %c0_i32_0 : i32, i32, i32
  }
  func.func @transform_14(%arg0: i32, %arg1: i32) -> (i32, i32, i32) {
    %c0_i32 = arith.constant 0 : i32
    %c0_i32_0 = arith.constant 0 : i32
    %c0_i32_1 = arith.constant 0 : i32
    return %arg1, %c0_i32, %c0_i32_0 : i32, i32, i32
  }
  func.func @transform_15(%arg0: i32, %arg1: i32) -> (i32, i32, i32) {
    %c0_i32 = arith.constant 0 : i32
    %c0_i32_0 = arith.constant 0 : i32
    %c0_i32_1 = arith.constant 0 : i32
    return %arg1, %c0_i32, %c0_i32_0 : i32, i32, i32
  }
  func.func @transform_16(%arg0: i32, %arg1: i32) -> (i32, i32, i32) {
    %c0_i32 = arith.constant 0 : i32
    %c0_i32_0 = arith.constant 0 : i32
    %c0_i32_1 = arith.constant 0 : i32
    return %arg1, %c0_i32, %c0_i32_0 : i32, i32, i32
  }
  func.func @transform_17(%arg0: i32, %arg1: i32) -> (i32, i32, i32) {
    %c0_i32 = arith.constant 0 : i32
    %c0_i32_0 = arith.constant 0 : i32
    %c0_i32_1 = arith.constant 0 : i32
    return %arg1, %c0_i32, %c0_i32_0 : i32, i32, i32
  }
  func.func @transform_18(%arg0: i32, %arg1: i32) -> (i32, i32, i32) {
    %c0_i32 = arith.constant 0 : i32
    %c0_i32_0 = arith.constant 0 : i32
    %c0_i32_1 = arith.constant 0 : i32
    return %arg1, %c0_i32, %c0_i32_0 : i32, i32, i32
  }
  func.func @transform_19(%arg0: i32, %arg1: i32) -> (i32, i32, i32) {
    %c0_i32 = arith.constant 0 : i32
    %c0_i32_0 = arith.constant 0 : i32
    %c0_i32_1 = arith.constant 0 : i32
    return %arg0, %c0_i32, %c0_i32_0 : i32, i32, i32
  }
  func.func @transform_20(%arg0: i32, %arg1: i32) -> (i32, i32, i32) {
    %c0_i32 = arith.constant 0 : i32
    %c0_i32_0 = arith.constant 0 : i32
    %c0_i32_1 = arith.constant 0 : i32
    return %arg0, %c0_i32, %c0_i32_0 : i32, i32, i32
  }
}

</mosaic_0001>

<bundles_post_ra>
// kernel: clip_vision_encoder_forward.1
= control target key start
LH: loop header
LB: loop body
LE: loop exit
PB: predicated region body
PF: predicated region fallthrough
CT: control target
= control target key end

     0   :  { %s2850_s0 = inlined_call_operand.vmem [shape: bf16[2,8,256], index: 0, kind: input, shape index: {}]   ;;  %s2851_s1 = inlined_call_operand.vmem [shape: bf16[256,32], index: 1, kind: input, shape index: {}]   ;;  %s2852_s2 = inlined_call_operand.vmem [shape: f32[8,32], index: 2, kind: input, shape index: {}]   ;;  %s2853_s3 = inlined_call_operand.vmem [shape: f32[1,32], index: 3, kind: input, shape index: {}]   ;;  %s2854_s4 = inlined_call_operand.vmem [shape: f32[1,32], index: 4, kind: input, shape index: {}]   ;;  %s2855_s5 = inlined_call_operand.vmem [shape: f32[1,32], index: 5, kind: input, shape index: {}]   ;;  %s2856_s6 = inlined_call_operand.vmem [shape: f32[1,32], index: 6, kind: input, shape index: {}]   ;;  %s2857_s7 = inlined_call_operand.vmem [shape: f32[2,1,32], index: 7, kind: input, shape index: {}]   ;;  %s2858_s8 = inlined_call_operand.vmem [shape: f32[2,1,32], index: 8, kind: input, shape index: {}]   ;;  %s2859_s9 = inlined_call_operand.vmem [shape: bf16[2,32,96], index: 9, kind: input, shape index: {}]   ;;  %s2860_s10 = inlined_call_operand.vmem [shape: f32[2,1,96], index: 10, kind: input, shape index: {}]   ;;  %s2861_s11 = inlined_call_operand.vmem [shape: bf16[2,32,32], index: 11, kind: input, shape index: {}]   ;;  %s2862_s12 = inlined_call_operand.vmem [shape: f32[2,1,32], index: 12, kind: input, shape index: {}]   ;;  %s2863_s13 = inlined_call_operand.vmem [shape: f32[2,1,32], index: 13, kind: input, shape index: {}]   ;;  %s2864_s14 = inlined_call_operand.vmem [shape: f32[2,1,32], index: 14, kind: input, shape index: {}]   ;;  %s2865_s15 = inlined_call_operand.vmem [shape: bf16[2,32,128], index: 15, kind: input, shape index: {}]   ;;  %s2866_s16 = inlined_call_operand.vmem [shape: f32[2,1,128], index: 16, kind: input, shape index: {}]   ;;  %s2867_s17 = inlined_call_operand.vmem [shape: bf16[2,128,32], index: 17, kind: input, shape index: {}]   ;;  %s2868_s18 = inlined_call_operand.vmem [shape: f32[2,1,32], index: 18, kind: input, shape index: {}]   ;;  %s2869_s19 = inlined_call_operand.vmem [shape: f32[2,8,32], index: 19, kind: output, shape index: {0}]   ;;  %s2870_s20 = inlined_call_operand.hbm [shape: f32[2,1,32], index: 20, kind: output, shape index: {1}]  }
   0x1   :  { %2885 = sst [smem:[#allocation18_spill]] %s2850_s0 }
   0x2   :  { %2886 = sst [smem:[#allocation19_spill]] %s2851_s1 }
   0x3   :  { %2887 = sst [smem:[#allocation20_spill]] %s2852_s2 }
   0x4   :  { %2888 = sst [smem:[#allocation21_spill]] %s2853_s3 }
   0x5   :  { %2889 = sst [smem:[#allocation22_spill]] %s2854_s4 }
   0x6   :  { %2890 = sst [smem:[#allocation23_spill]] %s2855_s5 }
   0x7   :  { %2891 = sst [smem:[#allocation24_spill]] %s2856_s6 }
   0x8   :  { %2892 = sst [smem:[#allocation25_spill]] %s2857_s7 }
   0x9   :  { %2893 = sst [smem:[#allocation26_spill]] %s2858_s8 }
   0xa   :  { %2894 = sst [smem:[#allocation27_spill]] %s2859_s9 }
   0xb   :  { %2895 = sst [smem:[#allocation28_spill]] %s2861_s11 }
   0xc   :  { %2896 = sst [smem:[#allocation29_spill]] %s2869_s19 }
   0xd   :  { %2897 = sst [smem:[#allocation30_spill]] %s2870_s20 }
   0xe   :  { %26 = vsyncpa [#allocation4], 0 }
   0xf   :  { %28 = vsyncpa [#allocation4 + $0x1], 0  ;;  %s2460_s1 = smov 0   ;;  %s2462_s22 = smov 0  }
  0x10   :  { %s2464_s23 = smov 0   ;;  %s2466_s24 = smov 0  }
  0x11   :  { %s2468_s2 = smov 0   ;;  %s2470_s25 = smov 0  }
  0x12   :  { %s2472_s3 = smov 0   ;;  %s2474_s26 = smov 0  }
  0x13 LB: > { %2898 = sst [smem:[#allocation6_spill]] %s2315_s1  ;;  %s1926_s27 = sadd.s32 4294967295, %s2343_s26   ;;  %s2343_s26 = sphi %s2474_s26, %s34_s26   ;;  %s2339_s3 = sphi %s2472_s3, %s2949_s3   ;;  %s2335_s25 = sphi %s2470_s25, %s2948_s25   ;;  %s2331_s2 = sphi %s2468_s2, %s2947_s2   ;;  %s2327_s24 = sphi %s2466_s24, %s2946_s24   ;;  %s2323_s23 = sphi %s2464_s23, %s2945_s23   ;;  %s2319_s22 = sphi %s2462_s22, %s2951_s22   ;;  %s2315_s1 = sphi %s2460_s1, %s2950_s1  }
  0x14   : > { %2899 = sst [smem:[#allocation7_spill]] %s2323_s23  ;;  %s1927_s28 = sadd.s32 4294967294, %s2343_s26  }
  0x15   : > { %2900 = sst [smem:[#allocation8_spill]] %s2327_s24  ;;  %s43_s4 = sadd.s32 1, %s2335_s25 }
  0x16   : > { %2901 = sst [smem:[#allocation9_spill]] %s2331_s2  ;;  %p44_p0 = scmp.ge.s32.totalorder %s43_s4, 2 }
  0x17   : > { %2902 = sst [smem:[#allocation10_spill]] %s2335_s25  ;;  %s46_s29 = sadd.s32 1, %s2339_s3 }
  0x18   : > { %2903 = sst [smem:[#allocation11_spill]] %s2339_s3  ;;  %p553_p1 = scmp.ne.s32.totalorder %s2323_s23, %s2319_s22 }
  0x19   : > { %2904 = sst [smem:[#allocation12_spill]] %s2343_s26  ;;  %p554_p2 = scmp.eq.s32.totalorder %s1926_s27, 3 }
  0x1a   : > { %s2953_s4 = smov (%p44_p0, %s43_s4), 0  ;;  %s2955_s29 = smov (!%p44_p0, %s46_s29), %s2339_s3 }
  0x1b   : > { %2905 = sst [smem:[#allocation13_spill]] %s2953_s4  ;;  %p2509_p3 = por %p554_p2, %p553_p1 }
  0x1c   : > { %p559_p4 = scmp.ne.s32.totalorder %s2319_s22, %s2315_s1  ;;  %p48_p5 = scmp.ge.s32.totalorder %s2955_s29, 2 }
  0x1d   : > { %s2906_s30 = scalar_select %p2509_p3, 1, 0 }
  0x1e   : > { %p560_p6 = scmp.eq.s32.totalorder %s1927_s28, 3  ;;  %p1930_p7 = scmp.ge.s32.totalorder %s2343_s26, 1 }
  0x1f   : > { %2907 = sst [smem:[#allocation14_spill]] %s2906_s30  ;;  %p684_p8 = scmp.lt.s32.totalorder %s2343_s26, 5 }
  0x20   : > { %s2957_s29 = smov (%p48_p5, %s2955_s29), 0  ;;  %p2519_p9 = por %p560_p6, %p559_p4 }
  0x21   : > { %2908 = sst [smem:[#allocation15_spill]] %s2957_s29  ;;  %p685_p10 = pnand %p1930_p7, %p684_p8 }
  0x22   : > { %s2909_s0 = scalar_select %p2519_p9, 1, 0 }
  0x23   : > { %s540_s21 = ssub.s32 %s2339_s3, %s2957_s29  ;;  %s543_s27 = sadd.s32 1, %s2323_s23 }
  0x24   : > { %2910 = sst [smem:[#allocation16_spill]] %s2909_s0  ;;  %p541_p11 = scmp.eq.s32.totalorder %s540_s21, 0 }
  0x25   : > { %688 = sbr.rel (%p685_p10) target bundleno = 3485 (0xd9d), region = 96  ;;  %p789_p12 = scmp.lt.s32.totalorder (!%p685_p10), %s2331_s2, 1 }
  0x26   : > { %s2527_s4 = scalar_select %p541_p11, %s2323_s23, %s543_s27  }
  0x27   : > { %p794_p13 = scmp.lt.s32.totalorder (!%p685_p10), %s2327_s24, 1  ;;  %s2912_s3 = sld [smem:[#allocation18_spill]] (!%p685_p10) }
  0x28   : > { %2911 = sst [smem:[#allocation17_spill]] %s2527_s4  ;;  %s2915_s9 = sld [smem:[#allocation27_spill]] (!%p685_p10) }
  0x29   : > { %s2916_s11 = sld [smem:[#allocation28_spill]] (!%p685_p10)  ;;  %s2919_s29 = sld [smem:[#allocation8_spill]] (!%p685_p10) }
  0x2c   : > { %s790_s25 = scalar_select %p789_p12, %s2331_s2, 1 }
  0x2d   : > { %s2534_s1 = scalar_select %p794_p13, %s2327_s24, 1 }
  0x2e   : > { %s1996_s21 = sshll.u32 %s790_s25, 3 }
  0x2f   : > { %s2539_s28 = scalar_lea.vmem %s2912_s3, %s1996_s21  ;;  %s1997_s2 = sshll.u32 %s2534_s1, 4 }
  0x30   : > { %s2553_s24 = scalar_lea.vmem %s2915_s9, %s1997_s2  ;;  %s2562_s23 = scalar_lea.vmem %s2916_s11, %s1997_s2 }
  0x31   : > { %s2579_s25 = scalar_lea.vmem %s2865_s15, %s1997_s2  ;;  %s2000_s11 = sshll.u32 %s2534_s1, 6 }
  0x32   : > { %s2593_s8 = scalar_lea.vmem %s2867_s17, %s2000_s11  ;;  %s2917_s9 = sld [smem:[#allocation29_spill]] }
  0x33   : > { %s2918_s2 = sand.u32 1, %s2319_s22   ;;  %p1942_p0 = scmp.ne.s32.totalorder %s2919_s29, 0 }
  0x34   : > { %s2602_s19 = scalar_lea.vmem [#allocation3], %s2918_s2  ;;  %s2920_s0 = sld [smem:[#allocation19_spill]] (!%p1942_p0)  ;;  %v847_v11 = vld [vmem:[%s2539_s28] sm:$0xff] (!%p1942_p0)  ;;  %vm1026_vm0 = vcmask (!%p1942_p0), 261120  }
  0x35   : > { %846 = sbr.rel (%p1942_p0) target bundleno = 622 (0x26e), region = 100  ;;  %v1944_v12 = vcombine.high (!%p1942_p0), %v847_v11, %v847_v11  ;;  %v1943_v18 = vcombine.low (!%p1942_p0), %v847_v11, %v847_v11  ;;  %s2922_s3 = sld [smem:[#allocation21_spill]] (!%p1942_p0) }
  0x36   : > { %s2923_s2 = sld [smem:[#allocation22_spill]] (!%p1942_p0) }
  0x37   : > { %1016 = vmatprep.mubr.bf16.mxu0 (!%p1942_p0), %v1944_v12 }
  0x38   : > { %s2598_s7 = scalar_lea.vmem %s2917_s9, %s1996_s21  ;;  %s2921_s21 = sld [smem:[#allocation20_spill]] (!%p1942_p0) }
  0x3a   : > { %v2197_v0 = vld [vmem:[%s2920_s0 + $0x40] sm:$0xff] (!%p1942_p0)   ;;  %v2199_v2 = vld [vmem:[%s2920_s0 + $0x48] sm:$0xff] (!%p1942_p0)   ;;  %v2201_v4 = vld [vmem:[%s2920_s0 + $0x50] sm:$0xff] (!%p1942_p0)  }
  0x3b   : > { %v2198_v1 = vld [vmem:[%s2920_s0] sm:$0xff] (!%p1942_p0)   ;;  %2001 = vmatprep.subr.bf16.mxu0 (!%p1942_p0), %v2197_v0  ;;  %v2200_v3 = vld [vmem:[%s2920_s0 + $0x8] sm:$0xff] (!%p1942_p0)   ;;  %v2202_v5 = vld [vmem:[%s2920_s0 + $0x10] sm:$0xff] (!%p1942_p0)  }
  0x3c   : > { %2002 = vmatpush3.bf16.msra.mxu0 %v2198_v1  ;;  %v2203_v6 = vld [vmem:[%s2920_s0 + $0x58] sm:$0xff]   ;;  %v2205_v8 = vld [vmem:[%s2920_s0 + $0x60] sm:$0xff]   ;;  %v2207_v10 = vld [vmem:[%s2920_s0 + $0x68] sm:$0xff]  }
  0x3d   : > { %2003 = vmatprep.subr.bf16.mxu0 %v2199_v2  ;;  %v2204_v7 = vld [vmem:[%s2920_s0 + $0x18] sm:$0xff]   ;;  %v2206_v9 = vld [vmem:[%s2920_s0 + $0x20] sm:$0xff]   ;;  %v2208_v13 = vld [vmem:[%s2920_s0 + $0x28] sm:$0xff]  }
  0x3e   : > { %v2209_v14 = vld [vmem:[%s2920_s0 + $0x70] sm:$0xff]   ;;  %v2211_v16 = vld [vmem:[%s2920_s0 + $0x78] sm:$0xff]   ;;  %v880_v21 = vld [vmem:[%s2921_s21] sm:$0xff] }
  0x3f   : > { %v2210_v15 = vld [vmem:[%s2920_s0 + $0x30] sm:$0xff]   ;;  %v2212_v17 = vld [vmem:[%s2920_s0 + $0x38] sm:$0xff]   ;;  %v1961_v36 = vld [vmem:[%s2922_s3] ss:$0 sm:$0xff] }
  0x40   : > { %2004 = vmatpush3.bf16.msra.mxu0 %v2200_v3  ;;  %v1962_v38 = vld [vmem:[%s2923_s2] ss:$0 sm:$0xff] }
  0x41   : > { %2005 = vmatprep.subr.bf16.mxu0 %v2201_v4 }
  0x44   : > { %2006 = vmatpush3.bf16.msra.mxu0 %v2202_v5 }
  0x45   : > { %2007 = vmatprep.subr.bf16.mxu0 %v2203_v6 }
  0x48   : > { %2008 = vmatpush3.bf16.msra.mxu0 %v2204_v7 }
  0x49   : > { %2009 = vmatprep.subr.bf16.mxu0 %v2205_v8 }
  0x4c   : > { %2010 = vmatpush3.bf16.msra.mxu0 %v2206_v9 }
  0x4d   : > { %2011 = vmatprep.subr.bf16.mxu0 %v2207_v10 }
  0x50   : > { %2012 = vmatpush3.bf16.msra.mxu0 %v2208_v13 }
  0x51   : > { %2013 = vmatprep.subr.bf16.mxu0 %v2209_v14 }
  0x54   : > { %2014 = vmatpush3.bf16.msra.mxu0 %v2210_v15 }
  0x55   : > { %2015 = vmatprep.subr.bf16.mxu0 %v2211_v16 }
  0x58   : > { %2016 = vmatpush3.bf16.msra.mxu0 %v2212_v17 }
  0x5b   : > { %1017 = vmatmul.mubr.bf16.vlgmr.msra.gmra.mrb[0].mxu0 %v1943_v18 }
 0x12e   : > { %v2017_v19 = vpop.f32.mrb[0].mxu0 }
 0x12f   : > { %v2018_v20 = vpop.f32.mrb[1].mxu0 }
 0x130   : > { %v2019_v22 = vadd.f32 %v2018_v20, %v2017_v19  ;;  %v2020_v23 = vpop.f32.mrb[2].mxu0 }
 0x131   : > { %v2021_v24 = vpop.f32.mrb[3].mxu0 }
 0x132   : > { %v1019_v25 = vadd.f32 %v2019_v22, %v880_v21 }
 0x134   : > { %v1027_v26 = vsel %vm1026_vm0, %v1019_v25, 0.0 }
 0x135   : > { %1028 = vadd.xlane.f32.xlu0 %v1027_v26 }
 0x1c2   : > { %v1029_v27 = vpop.xlane.xlu0 %1028 }
 0x1c3   : > { %v1031_v28 = vmul.f32 0.03125, %v1029_v27 }
 0x1c5   : > { %v1032_v29 = vsub.f32 %v1019_v25, %v1031_v28 }
 0x1c7   : > { %v1033_v30 = vmul.f32 %v1032_v29, %v1032_v29 }
 0x1c9   : > { %v1034_v31 = vsel %vm1026_vm0, %v1033_v30, 0.0 }
 0x1ca   : > { %1035 = vadd.xlane.f32.xlu0 %v1034_v31 }
 0x257   : > { %v1036_v32 = vpop.xlane.xlu0 %1035 }
 0x258   : > { %v1037_v33 = vmul.f32 0.03125, %v1036_v32 }
 0x25a   : > { %v1038_v34 = vadd.f32 1e-05, %v1037_v33 }
 0x25c   : > { %2215 = vrsqrt.f32 %v1038_v34 }
 0x266   : > { %v2216_v35 = vpop.eup %2215 }
 0x267   : > { %v1040_v37 = vmul.f32 %v2216_v35, %v1032_v29 }
 0x269   : > { %v1047_v39 = vmul.f32 %v1961_v36, %v1040_v37 }
 0x26b   : > { %v1054_v40 = vadd.f32 %v1962_v38, %v1047_v39 }
 0x26d   : > { %1055 = vst.msk [vmem:[#allocation2] sm:$0xff] %vm1026_vm0, %v1054_v40 }
 0x26e PF: > { %vm1063_vm1 = vcmask 261120   ;;  %v2217_v48 = vld [vmem:[%s2553_s24] sm:$0xff]   ;;  %v2345_v49 = vmov 0.0   ;;  %vm2346_vm2 = vmmov 0   ;;  %v2218_v50 = vld [vmem:[%s2553_s24 + $0x8] sm:$0xff]   ;;  %s2924_s28 = sld [smem:[#allocation25_spill]]  ;;  %s2928_s5 = scalar_lea.vmem %s2860_s10, %s2534_s1  ;;  %v1056_v9 = vlaneseq }
 0x26f   : > { %2049 = vmatprep.subr.bf16.mxu0 %v2345_v49  ;;  %2053 = vmatprep.mubr.msk.bf16.mxu0 %vm2346_vm2, %v2345_v49  ;;  %s2926_s30 = sld [smem:[#allocation26_spill]]  ;;  %v1965_v61 = vld [vmem:[%s2928_s5] ss:$0 sm:$0xff]  ;;  %s2347_s3 = smov 112   ;;  %vm1163_vm3 = vcmask 130048   ;;  %vm1210_vm5 = vcmask 64512  }
 0x270   : > { %2050 = vmatpush3.bf16.msra.mxu0 %v2217_v48  ;;  %2069 = vmatprep.subr.bf16.mxu1 %v2345_v49  ;;  %s2348_s20 = smov 96   ;;  %s2349_s6 = smov 80   ;;  %v1057_v10 = vand.u32 127, %v1056_v9  ;;  %v2350_v11 = vmov -1e+09   ;;  %vm1228_vm6 = vcmask 1043456  }
 0x271   : > { %2051 = vmatprep.subr.bf16.mxu0 %v2345_v49  ;;  %2071 = vmatprep.mubr.msk.bf16.mxu1 %vm2346_vm2, %v2345_v49  ;;  %s2351_s2 = smov 48   ;;  %s2352_s29 = smov 64   ;;  %v2219_v48 = vld [vmem:[%s2562_s23] sm:$0xff]  }
 0x272   : > { %vm1058_vm4 = vcmp.lt.s32.totalorder %v1057_v10, 5  ;;  %s2353_s27 = smov 16  }
 0x273   : > { %v1059_v12 = vsel %vm1058_vm4, 0.0, %v2350_v11  ;;  %v2222_v11 = vld [vmem:[%s2579_s25 + $0x8] sm:$0xff]  }
 0x274   : > { %v2666_v41 = vld [vmem:[#allocation2] sm:$0xff]  ;;  %2052 = vmatpush3.bf16.msra.mxu0 %v2218_v50  ;;  %s2925_s24 = scalar_lea.vmem %s2924_s28, %s2534_s1  ;;  %v2220_v50 = vld [vmem:[%s2562_s23 + $0x8] sm:$0xff]  }
 0x275   : > { %v1064_v42 = vsel %vm1063_vm1, %v2666_v41, 0.0  ;;  %2057 = vmatprep.subr.bf16.mxu0 %v2345_v49  ;;  %v1963_v55 = vld [vmem:[%s2925_s24] ss:$0 sm:$0xff]  ;;  %s2927_s9 = scalar_lea.vmem %s2926_s30, %s2534_s1  ;;  %s2929_s24 = scalar_lea.vmem %s2862_s12, %s2534_s1 }
 0x276   : > { %1065 = vadd.xlane.f32.xlu0 %v1064_v42  ;;  %v1964_v57 = vld [vmem:[%s2927_s9] ss:$0 sm:$0xff]  ;;  %s2930_s30 = scalar_lea.vmem %s2863_s13, %s2534_s1 }
 0x303   : > { %v1066_v43 = vpop.xlane.xlu0 %1065 }
 0x304   : > { %v1068_v44 = vmul.f32 0.03125, %v1066_v43 }
 0x306   : > { %v1069_v45 = vsub.f32 %v2666_v41, %v1068_v44 }
 0x308   : > { %v1070_v46 = vmul.f32 %v1069_v45, %v1069_v45 }
 0x30a   : > { %v1071_v47 = vsel %vm1063_vm1, %v1070_v46, 0.0 }
 0x30b   : > { %1072 = vadd.xlane.f32.xlu0 %v1071_v47 }
 0x398   : > { %v1073_v51 = vpop.xlane.xlu0 %1072 }
 0x399   : > { %v1074_v52 = vmul.f32 0.03125, %v1073_v51 }
 0x39b   : > { %v1075_v53 = vadd.f32 1e-05, %v1074_v52 }
 0x39d   : > { %2231 = vrsqrt.f32 %v1075_v53 }
 0x3a7   : > { %v2232_v54 = vpop.eup %2231 }
 0x3a8   : > { %v1077_v56 = vmul.f32 %v2232_v54, %v1069_v45 }
 0x3aa   : > { %v1084_v58 = vmul.f32 %v1963_v55, %v1077_v56 }
 0x3ac   : > { %v1091_v59 = vadd.f32 %v1964_v57, %v1084_v58 }
 0x3ae   : > { %v1096_v60 = vpack.c.bf16 %v1091_v59, %v1091_v59 }
 0x3b0   : > { %2054 = vmatmul.mubr.msk.bf16.vlgmr.msra.gmra.mrb[0].mxu0 %vm1063_vm1, %v1096_v60 }
 0x3b1   : > { %2059 = vmatprep.mubr.msk.bf16.mxu0 %vm2346_vm2, %v2345_v49 }
 0x483   : > { %v1153_v62 = vpop.f32.mrb[0].mxu0 }
 0x484   : > { %v1154_v63 = vadd.f32 %v1965_v61, %v1153_v62  ;;  %v2055_v0 = vpop.f32.mrb[1].mxu0 }
 0x485   : > { %v1156_v1 = vpop.f32.mrb[2].mxu0 }
 0x486   : > { %v1159_v2 = vpack.c.bf16 %v1154_v63, %v1154_v63  ;;  %v2056_v3 = vpop.f32.mrb[3].mxu0  ;;  %v1976_v63 = vld [vmem:[%s2929_s24] ss:$0 sm:$0xff] }
 0x488   : > { %1272 = vrot.lane.b32.xlu0 %v1159_v2, %s2347_s3  ;;  %1161 = vrot.lane.b32.xlu1 %v1159_v2, %s2348_s20  ;;  %s2932_s3 = scalar_lea.vmem %s2866_s16, %s2534_s1 }
 0x48c   : > { %1274 = vrot.lane.b32.xlu1 %v1159_v2, %s2349_s6  ;;  %s2933_s6 = scalar_lea.vmem %s2868_s18, %s2534_s1 }
 0x4fa   : > { %v1162_v4 = vpop.permute.xlu1 %1161  ;;  %v1273_v8 = vpop.permute.xlu0 %1272 }
 0x4fb   : > { %v1168_v5 = vsel %vm1163_vm3, %v1162_v4, 0 }
 0x4fc   : > { %2058 = vmatpush3.bf16.xpose.msra.mxu0 %v1168_v5 }
 0x4fd   : > { %2063 = vmatprep.subr.bf16.mxu0 %v2345_v49 }
 0x4fe   : > { %v1275_v6 = vpop.permute.xlu1 %1274 }
 0x4ff   : > { %v1280_v7 = vsel %vm1163_vm3, %v1275_v6, 0 }
 0x500   : > { %2070 = vmatpush3.bf16.xpose.msra.mxu1 %v1280_v7 }
 0x501   : > { %2081 = vmatprep.subr.bf16.mxu1 %v2345_v49 }
 0x503   : > { %2060 = vmatmul.mubr.msk.bf16.vlgmr.msra.gmra.mrb[4].mxu0 %vm1163_vm3, %v1159_v2 }
 0x504   : > { %2065 = vmatprep.mubr.msk.bf16.mxu0 %vm2346_vm2, %v2345_v49 }
 0x507   : > { %2072 = vmatmul.mubr.msk.bf16.vlgmr.msra.gmra.mrb[0].mxu1 %vm1163_vm3, %v1273_v8 }
 0x508   : > { %2085 = vmatprep.mubr.msk.bf16.mxu1 %vm2346_vm2, %v2345_v49  ;;  %2082 = vmatpush3.bf16.msra.mxu1 %v2219_v48 }
 0x509   : > { %2083 = vmatprep.subr.bf16.mxu1 %v2345_v49 }
 0x50c   : > { %2084 = vmatpush3.bf16.msra.mxu1 %v2220_v50 }
 0x50d   : > { %2097 = vmatprep.subr.bf16.mxu1 %v2345_v49 }
 0x5d6   : > { %v1204_v13 = vpop.f32.mrb[4].mxu0 }
 0x5d7   : > { %v1205_v14 = vadd.f32 %v1204_v13, %v1059_v12  ;;  %v2061_v15 = vpop.f32.mrb[5].mxu0 }
 0x5d8   : > { %v1207_v16 = vpop.f32.mrb[6].mxu0 }
 0x5d9   : > { %v2062_v17 = vpop.f32.mrb[7].mxu0  ;;  %v1211_v18 = vsel %vm1210_vm5, %v1205_v14, -inf  ;;  %v1977_v16 = vld [vmem:[%s2930_s30] ss:$0 sm:$0xff] }
 0x5da   : > { %v1316_v19 = vpop.f32.mrb[0].mxu1  ;;  %1212 = vmax.xlane.f32.xlu1 %v1211_v18 }
 0x5db   : > { %v1317_v20 = vadd.f32 %v1316_v19, %v1059_v12  ;;  %v2073_v21 = vpop.f32.mrb[1].mxu1 }
 0x5dc   : > { %v1319_v22 = vpop.f32.mrb[2].mxu1 }
 0x5dd   : > { %v2074_v23 = vpop.f32.mrb[3].mxu1  ;;  %v1322_v24 = vsel %vm1210_vm5, %v1317_v20, -inf  ;;  %v2223_v22 = vld [vmem:[%s2593_s8] sm:$0xff]  }
 0x5de   : > { %1323 = vmax.xlane.f32.xlu0 %v1322_v24  ;;  %v2224_v23 = vld [vmem:[%s2593_s8 + $0x8] sm:$0xff]   ;;  %v2225_v24 = vld [vmem:[%s2593_s8 + $0x10] sm:$0xff]  }
 0x5f4   : > { %1334 = vrot.lane.b32.xlu0 %v1159_v2, %s2351_s2  ;;  %s2934_s2 = sld [smem:[#allocation8_spill]] }
 0x5fa   : > { %p1992_p1 = scmp.ne.s32.totalorder %s2934_s2, 1 }
 0x5fb   : > { %vm1679_vm7 = vcmask (!%p1992_p1), 253952   ;;  %s2936_s28 = sld [smem:[#allocation24_spill]] (!%p1992_p1) }
 0x667   : > { %v1213_v25 = vpop.xlane.xlu1 %1212 }
 0x668   : > { %v1214_v26 = vsub.f32 %v1205_v14, %v1213_v25  ;;  %v2226_v25 = vld [vmem:[%s2593_s8 + $0x18] sm:$0xff]  }
 0x66a   : > { %v1215_v27 = vmul.f32 1.442695, %v1214_v26  ;;  %v2227_v26 = vld [vmem:[%s2593_s8 + $0x20] sm:$0xff]  }
 0x66b   : > { %v1324_v28 = vpop.xlane.xlu0 %1323 }
 0x66c   : > { %2233 = vpow2.f32 %v1215_v27  ;;  %v1325_v29 = vsub.f32 %v1317_v20, %v1324_v28  ;;  %v2228_v27 = vld [vmem:[%s2593_s8 + $0x28] sm:$0xff]   ;;  %v2229_v28 = vld [vmem:[%s2593_s8 + $0x30] sm:$0xff]  }
 0x66e   : > { %v1326_v30 = vmul.f32 1.442695, %v1325_v29  ;;  %v2230_v29 = vld [vmem:[%s2593_s8 + $0x38] sm:$0xff]  }
 0x66f   : > { %v1335_v42 = vpop.permute.xlu0 %1334 }
 0x670   : > { %2235 = vpow2.f32 %v1326_v30  ;;  %v1340_v45 = vsel %vm1228_vm6, %v1335_v42, 0  ;;  %v1979_v30 = vld [vmem:[%s2932_s3] ss:$0 sm:$0xff] }
 0x676   : > { %v2234_v31 = vpop.eup %2233 }
 0x677   : > { %v1217_v32 = vsel %vm1210_vm5, %v2234_v31, 0.0 }
 0x678   : > { %1218 = vadd.xlane.f32.xlu1 %v1217_v32 }
 0x67a   : > { %v2236_v33 = vpop.eup %2235 }
 0x67b   : > { %v1328_v34 = vsel %vm1210_vm5, %v2236_v33, 0.0 }
 0x67c   : > { %1329 = vadd.xlane.f32.xlu1 %v1328_v34 }
 0x68d   : > { %1223 = vrot.lane.b32.xlu1 %v1159_v2, %s2352_s29 }
 0x705   : > { %v1219_v35 = vpop.xlane.xlu1 %1218 }
 0x706   : > { %2237 = vrcp.f32 %v1219_v35 }
 0x709   : > { %v1330_v36 = vpop.xlane.xlu1 %1329 }
 0x70a   : > { %2239 = vrcp.f32 %v1330_v36 }
 0x70d   : > { %v1224_v37 = vpop.permute.xlu1 %1223 }
 0x70e   : > { %v1230_v38 = vsel %vm1228_vm6, %v1224_v37, 0 }
 0x70f   : > { %2064 = vmatpush3.bf16.msra.mxu0 %v1230_v38 }
 0x710   : > { %v2238_v39 = vpop.eup %2237  ;;  %2075 = vmatprep.subr.bf16.mxu0 %v2345_v49 }
 0x711   : > { %v1221_v40 = vmul.f32 %v2238_v39, %v2234_v31 }
 0x713   : > { %v1222_v43 = vpack.c.bf16 %v1221_v40, %v1221_v40 }
 0x714   : > { %v2240_v44 = vpop.eup %2239 }
 0x715   : > { %2066 = vmatmul.mubr.msk.bf16.vlgmr.msra.gmra.mrb[8].mxu0 %vm1210_vm5, %v1222_v43  ;;  %v1332_v46 = vmul.f32 %v2240_v44, %v2236_v33  ;;  %v1983_v43 = vld [vmem:[%s2933_s6] ss:$0 sm:$0xff] }
 0x716   : > { %2076 = vmatpush3.bf16.msra.mxu0 %v1340_v45  ;;  %2077 = vmatprep.mubr.msk.bf16.mxu0 %vm2346_vm2, %v2345_v49 }
 0x717   : > { %2089 = vmatprep.subr.bf16.mxu0 %v2345_v49  ;;  %v1333_v47 = vpack.c.bf16 %v1332_v46, %v1332_v46 }
 0x71d   : > { %2078 = vmatmul.mubr.msk.bf16.vlgmr.msra.gmra.mrb[12].mxu0 %vm1210_vm5, %v1333_v47 }
 0x71e   : > { %2093 = vmatprep.mubr.msk.bf16.mxu0 %vm2346_vm2, %v2345_v49 }
 0x7e8   : > { %v1266_v51 = vpop.f32.mrb[8].mxu0 }
 0x7e9   : > { %v2067_v52 = vpop.f32.mrb[9].mxu0 }
 0x7ea   : > { %v1269_v53 = vpop.f32.mrb[10].mxu0 }
 0x7eb   : > { %v2068_v54 = vpop.f32.mrb[11].mxu0 }
 0x7f0   : > { %v1376_v55 = vpop.f32.mrb[12].mxu0 }
 0x7f1   : > { %1383 = vrot.lane.b32.xlu1 %v1376_v55, %s2353_s27  ;;  %v2079_v56 = vpop.f32.mrb[13].mxu0  ;;  %s2935_s27 = sld [smem:[#allocation23_spill]] (!%p1992_p1) }
 0x7f2   : > { %v1379_v57 = vpop.f32.mrb[14].mxu0 }
 0x7f3   : > { %v2080_v58 = vpop.f32.mrb[15].mxu0 }
 0x863   : > { %v1384_v59 = vpop.permute.xlu1 %1383 }
 0x864   : > { %v1386_v60 = vsel %vm1163_vm3, %v1266_v51, %v1384_v59 }
 0x865   : > { %v1391_v61 = vpack.c.bf16 %v1386_v60, %v1386_v60 }
 0x867   : > { %2086 = vmatmul.mubr.msk.bf16.vlgmr.msra.gmra.mrb[4].mxu1 %vm1063_vm1, %v1391_v61  ;;  %v1677_v61 = vld [vmem:[%s2935_s27] sm:$0x1] (!%p1992_p1) }
 0x868   : > { %2113 = vmatprep.mubr.msk.bf16.mxu1 %vm2346_vm2, %v2345_v49  ;;  %2098 = vmatpush3.bf16.msra.mxu1 %v2223_v22 }
 0x869   : > { %2099 = vmatprep.subr.bf16.mxu1 %v2345_v49 }
 0x86c   : > { %2100 = vmatpush3.bf16.msra.mxu1 %v2224_v23 }
 0x86d   : > { %2101 = vmatprep.subr.bf16.mxu1 %v2345_v49 }
 0x870   : > { %2102 = vmatpush3.bf16.msra.mxu1 %v2225_v24 }
 0x871   : > { %2103 = vmatprep.subr.bf16.mxu1 %v2345_v49 }
 0x874   : > { %2104 = vmatpush3.bf16.msra.mxu1 %v2226_v25 }
 0x875   : > { %2105 = vmatprep.subr.bf16.mxu1 %v2345_v49 }
 0x878   : > { %2106 = vmatpush3.bf16.msra.mxu1 %v2227_v26 }
 0x879   : > { %2107 = vmatprep.subr.bf16.mxu1 %v2345_v49 }
 0x87c   : > { %2108 = vmatpush3.bf16.msra.mxu1 %v2228_v27 }
 0x87d   : > { %2109 = vmatprep.subr.bf16.mxu1 %v2345_v49 }
 0x880   : > { %2110 = vmatpush3.bf16.msra.mxu1 %v2229_v28 }
 0x881   : > { %2111 = vmatprep.subr.bf16.mxu1 %v2345_v49 }
 0x884   : > { %2112 = vmatpush3.bf16.msra.mxu1 %v2230_v29 }
 0x93a   : > { %v1441_v62 = vpop.f32.mrb[4].mxu1 }
 0x93b   : > { %v1447_v0 = vadd.f32 %v1441_v62, %v2666_v41  ;;  %v2087_v1 = vpop.f32.mrb[5].mxu1  ;;  %v2221_v41 = vld [vmem:[%s2579_s25] sm:$0xff]   ;;  %s2931_s25 = scalar_lea.vmem %s2864_s14, %s2534_s1 }
 0x93c   : > { %v1444_v2 = vpop.f32.mrb[6].mxu1  ;;  %2090 = vmatpush3.bf16.msra.mxu0 %v2221_v41  ;;  %v1978_v18 = vld [vmem:[%s2931_s25] ss:$0 sm:$0xff] }
 0x93d   : > { %v2736_v3 = vadd.f32 %v1976_v63, %v1447_v0  ;;  %v2088_v4 = vpop.f32.mrb[7].mxu1  ;;  %2091 = vmatprep.subr.bf16.mxu0 %v2345_v49  ;;  %v1678_v63 = vld [vmem:[%s2936_s28] sm:$0x1] (!%p1992_p1) }
 0x93f   : > { %v1458_v5 = vsel %vm1063_vm1, %v2736_v3, 0.0 }
 0x940   : > { %1459 = vadd.xlane.f32.xlu1 %v1458_v5  ;;  %2092 = vmatpush3.bf16.msra.mxu0 %v2222_v11 }
 0x9cd   : > { %v1460_v6 = vpop.xlane.xlu1 %1459 }
 0x9ce   : > { %v1461_v7 = vmul.f32 0.03125, %v1460_v6 }
 0x9d0   : > { %v1462_v8 = vsub.f32 %v2736_v3, %v1461_v7 }
 0x9d2   : > { %v1463_v9 = vmul.f32 %v1462_v8, %v1462_v8 }
 0x9d4   : > { %v1464_v10 = vsel %vm1063_vm1, %v1463_v9, 0.0 }
 0x9d5   : > { %1465 = vadd.xlane.f32.xlu0 %v1464_v10 }
 0xa62   : > { %v1466_v12 = vpop.xlane.xlu0 %1465 }
 0xa63   : > { %v1467_v13 = vmul.f32 0.03125, %v1466_v12 }
 0xa65   : > { %v1468_v14 = vadd.f32 1e-05, %v1467_v13 }
 0xa67   : > { %2241 = vrsqrt.f32 %v1468_v14 }
 0xa71   : > { %v2242_v15 = vpop.eup %2241 }
 0xa72   : > { %v1470_v17 = vmul.f32 %v2242_v15, %v1462_v8 }
 0xa74   : > { %v1477_v19 = vmul.f32 %v1977_v16, %v1470_v17 }
 0xa76   : > { %v1484_v20 = vadd.f32 %v1978_v18, %v1477_v19 }
 0xa78   : > { %v1489_v21 = vpack.c.bf16 %v1484_v20, %v1484_v20 }
 0xa7a   : > { %2094 = vmatmul.mubr.msk.bf16.vlgmr.msra.gmra.mrb[16].mxu0 %vm1063_vm1, %v1489_v21 }
 0xb4d   : > { %v1546_v31 = vpop.f32.mrb[16].mxu0 }
 0xb4e   : > { %v1547_v32 = vadd.f32 %v1979_v30, %v1546_v31  ;;  %v2095_v33 = vpop.f32.mrb[17].mxu0 }
 0xb4f   : > { %v1549_v34 = vpop.f32.mrb[18].mxu0 }
 0xb50   : > { %v1552_v35 = vmul.f32 -1.702, %v1547_v32  ;;  %v2096_v36 = vpop.f32.mrb[19].mxu0 }
 0xb52   : > { %v1553_v37 = vmul.f32 1.442695, %v1552_v35 }
 0xb54   : > { %2243 = vpow2.f32 %v1553_v37 }
 0xb5e   : > { %v2244_v38 = vpop.eup %2243 }
 0xb5f   : > { %v1555_v39 = vadd.f32 1.0, %v2244_v38 }
 0xb61   : > { %2245 = vrcp.f32 %v1555_v39 }
 0xb6b   : > { %v2246_v49 = vpop.eup %2245 }
 0xb6c   : > { %v1557_v40 = vmul.f32 %v2246_v49, %v1547_v32 }
 0xb6e   : > { %v1574_v42 = vpack.c.bf16 %v1557_v40, %v1557_v40 }
 0xb70   : > { %2114 = vmatmul.mubr.bf16.vlgmr.msra.gmra.mrb[8].mxu1 %v1574_v42 }
 0xc42   : > { %1675 = sbr.rel (%p1992_p1) target bundleno = 3458 (0xd82), region = 104 }
 0xc43   : > { %v1664_v44 = vpop.f32.mrb[8].mxu1 }
 0xc44   : > { %v1665_v45 = vadd.f32 %v1983_v43, %v1664_v44  ;;  %v2115_v46 = vpop.f32.mrb[9].mxu1 }
 0xc45   : > { %v1667_v47 = vpop.f32.mrb[10].mxu1 }
 0xc46   : > { %v1670_v48 = vadd.f32 %v1665_v45, %v2736_v3  ;;  %v2116_v50 = vpop.f32.mrb[11].mxu1 }
 0xc48   : > { %1671 = vst.msk [vmem:[#allocation2] sm:$0xff] %vm1063_vm1, %v1670_v48  ;;  %1676 = vst.msk [vmem:[%s2598_s7] sm:$0xff] (!%p1992_p1), %vm1063_vm1, %v1670_v48  ;;  %v1680_v51 = vsel (!%p1992_p1), %vm1679_vm7, %v1670_v48, 0.0 }
 0xc49   : > { %1681 = vadd.xlane.f32.xlu0 %v1680_v51 }
 0xcd6   : > { %v1682_v52 = vpop.xlane.xlu0 %1681 }
 0xcd7   : > { %v1683_v53 = vmul.f32 0.03125, %v1682_v52 }
 0xcd9   : > { %v1684_v54 = vsub.f32 %v1670_v48, %v1683_v53 }
 0xcdb   : > { %v1685_v55 = vmul.f32 %v1684_v54, %v1684_v54 }
 0xcdd   : > { %v1686_v56 = vsel %vm1679_vm7, %v1685_v55, 0.0 }
 0xcde   : > { %1687 = vadd.xlane.f32.xlu0 %v1686_v56 }
 0xd6b   : > { %v1688_v57 = vpop.xlane.xlu0 %1687 }
 0xd6c   : > { %v1689_v58 = vmul.f32 0.03125, %v1688_v57 }
 0xd6e   : > { %v1690_v59 = vadd.f32 1e-05, %v1689_v58 }
 0xd70   : > { %2247 = vrsqrt.f32 %v1690_v59 }
 0xd7a   : > { %v2248_v60 = vpop.eup %2247 }
 0xd7b   : > { %v1692_v62 = vmul.f32 %v2248_v60, %v1684_v54 }
 0xd7d   : > { %v1693_v0 = vmul.f32 %v1692_v62, %v1677_v61 }
 0xd7f   : > { %v1694_v1 = vadd.f32 %v1693_v0, %v1678_v63 }
 0xd81   : > { %1695 = vst.msk [vmem:[%s2602_s19] sm:$0x1] %vm1679_vm7, %v1694_v1 }
 0xd82 PF: > { %s2937_s24 = sld [smem:[#allocation9_spill]]  ;;  %s2939_s21 = sld [smem:[#allocation30_spill]] }
 0xd83   : > { %s1716_s26 = sshll.u32 %s2602_s19, 4  ;;  %s2940_s5 = sand.u32 1, %s2319_s22   ;;  %s1717_s26 = int_to_ptr.vmem [resolvable:$true] %s1716_s26 }
 0xd84   : > { %s1701_s3 = scalar_lea.sflag [#allocation4], %s2940_s5  ;;  %s2249_s8 = scalar_lea.vmem %s1717_s26, 16 }
 0xd85   : > { %p2250_p2 = scmp.ne.s32.totalorder %s1717_s26, %s2249_s8  ;;  %s2354_s20 = smov [#allocation3]  }
 0xd86   : > { %s2253_s6 = sshll.u32 %s2354_s20, 4  ;;  %s2254_s6 = int_to_ptr.vmem [resolvable:$false] %s2253_s6 }
 0xd87   : > { %p2251_p4 = pnand %p2250_p2, %p2509_p3  ;;  %s2255_s2 = scalar_lea.vmem %s2254_s6, 32 }
 0xd88   : > { %s1993_s11 = sshll.u32 %s2937_s24, 4  ;;  %p2256_p6 = scmp.lt.s32.totalorder %s1717_s26, %s2254_s6 }
 0xd89   : > { %s2800_s25 = scalar_lea.hbm %s2939_s21, %s1993_s11  ;;  %p2252_p5 = pneg %p2251_p4 }
 0xd8a   : > { %p2257_p7 = scmp.lt.s32.totalorder %s2255_s2, %s2249_s8 }
 0xd8c   : > { %p2258_p8 = por %p2257_p7, %p2256_p6 }
 0xd8e   : > { %p2259_p10 = pnand %p2258_p8, %p2252_p5 }
 0xd90   : > { %2262 = shalt.err (!%p2259_p10)
}
 0xd91   : > { %s2263_s19 = scalar_lea.hbm %s2800_s25, 16  ;;  %s2267_s27 = scalar_lea.hbm %s2939_s21, 32 }
 0xd92   : > { %p2264_p11 = scmp.ne.s32.totalorder %s2800_s25, %s2263_s19  ;;  %p2268_p0 = scmp.lt.u32.totalorder %s2800_s25, %s2939_s21 }
 0xd93   : > { %p2269_p1 = scmp.lt.u32.totalorder %s2267_s27, %s2263_s19  ;;  %p2271_p4 = scmp.lt.u32.totalorder %s2263_s19, %s2800_s25 }
 0xd94   : > { %p2265_p12 = pnand %p2264_p11, %p2509_p3 }
 0xd95   : > { %p2270_p2 = por %p2269_p1, %p2268_p0 }
 0xd96   : > { %p2266_p13 = pneg %p2265_p12 }
 0xd97   : > { %p2272_p5 = por %p2271_p4, %p2270_p2 }
 0xd99   : > { %p2273_p6 = pnand %p2272_p5, %p2266_p13 }
 0xd9b   : > { %2276 = shalt.err (!%p2273_p6)
}
 0xd9c   : > { %2117 = dma.vmem_to_hbm [thread:$0]  (%p2509_p3), %s1717_s26, 16, %s2800_s25, %s1701_s3  }
 0xd9d PF: > { %s2941_s28 = sld [smem:[#allocation12_spill]]  ;;  %s2942_s24 = sld [smem:[#allocation6_spill]] }
 0xda3   : > { %p2123_p7 = scmp.ge.s32.totalorder %s2941_s28, 2  ;;  %s1735_s30 = sand.u32 1, %s2942_s24  }
 0xda4   : > { %s1736_s9 = scalar_lea.sflag [#allocation4], %s1735_s30 }
 0xda5   : > { %p2120_p8 = pnand %p2123_p7, %p2519_p9 }
 0xda7   : > { %2310 = dma.done.wait (!%p2120_p8), %s1736_s9, 16  }
 0xda8   : > { %2312 = vsyncadd (!%p2120_p8), %s1736_s9, 4294967280  ;;  %s34_s26 = sadd.s32 1, %s2941_s28   ;;  %s2944_s5 = sld [smem:[#allocation7_spill]] }
 0xda9   : > { %p31_p10 = scmp.ge.s32.totalorder %s34_s26, 6   ;;  %s2945_s23 = sld [smem:[#allocation17_spill]] }
 0xdaa   : > { %s2946_s24 = sld [smem:[#allocation10_spill]]  ;;  %s2947_s2 = sld [smem:[#allocation11_spill]] }
 0xdab   : > { %s2948_s25 = sld [smem:[#allocation13_spill]]  ;;  %s2949_s3 = sld [smem:[#allocation15_spill]] }
 0xdac   : > { %s2950_s1 = smov %s2319_s22  ;;  %33 = sbr.rel (!%p31_p10) target bundleno = 19 (0x13), region = 187 }
 0xdae   : > { %s2951_s22 = smov %s2944_s5 }
 0xdb3   :  { %1740 = vsyncpa [#allocation4], 1 }
 0xdb4   :  { %1742 = vsyncpa [#allocation4 + $0x1], 1 }

</bundles_post_ra>
